<compile_context>
chip_gen: v7x
topology: tpu7x:2x2x1
jax: 0.10.0
libtpu: 0.0.40
codegen_flags: <defaults>
</compile_context>

<pallas_src>
import functools

import jax
import jax.numpy as jnp
import numpy as np
from jax.experimental import pallas as pl
from jax.experimental.pallas import tpu as pltpu

_BIG = 1e30        # finite stand-in for the +inf DP boundary (exp(-_BIG/gamma) -> 0)
_B_BLK_MAX = 32    # max batch rows per grid step (4 sublane-aligned vregs of DP work)


def _soft_dtw_wavefront_kernel(x_ref, y_ref, out_ref, ddiag_ref, *, gamma):
    f32 = jnp.float32
    b_blk, n, d_feat = x_ref.shape
    m = y_ref.shape[1]
    ldp = ddiag_ref.shape[2]                 # DP lane width (multiple of 128, >= n+1)
    wd = n + m - 1                           # number of interior anti-diagonals
    lsk = ((n + m + 127) // 128) * 128       # skew lane width (>= n+m: no wraparound)

    x = x_ref[...].astype(f32)               # (B_blk, N, D)
    y = y_ref[...].astype(f32)               # (B_blk, M, D)

    # ---- pairwise squared-euclidean cost --------------------------------------
    if d_feat <= 32:
        # VPU path: direct (x - y)^2 accumulation, unrolled over the small feature
        # dim (no (N, M, D) intermediate, no Gram-matrix cancellation).
        delta = jnp.zeros((b_blk, n, m), f32)
        for f in range(d_feat):
            diff = x[:, :, f][:, :, None] - y[:, :, f][:, None, :]
            delta = delta + diff * diff
    else:
        # MXU path for large feature dims.
        xs = jnp.sum(x * x, axis=-1)[:, :, None]
        ys = jnp.sum(y * y, axis=-1)[:, None, :]
        cross = jnp.einsum("bnd,bmd->bnm", x, y, preferred_element_type=f32)
        delta = jnp.maximum(xs + ys - 2.0 * cross, 0.0)

    # ---- stage delta in diagonal-major (skewed) layout -------------------------
    # Target: ddiag_ref[k, b, i] = delta[b, i-1, (k+1)-i] for i in [1, N]; other
    # lanes are don't-care (masked / never read by valid lanes in the DP).
    dpad = jnp.pad(delta, ((0, 0), (0, 0), (0, lsk - m)))         # (B, N, LSK)
    rows = []
    for b in range(b_blk):                   # rank-2 strided rolls: row r -> shift 1+r
        rows.append(pltpu.roll(dpad[b], shift=1, axis=1, stride=1, stride_axis=0))
    rolled = jnp.stack(rows, axis=0)                              # (B, N, LSK)
    skew = jnp.pad(rolled, ((0, 0), (1, ldp - 1 - n), (0, 0)))    # row r -> DP lane i=r+1
    skew_t = jnp.swapaxes(skew, 1, 2)                             # (B, LSK, LDP)
    for k in range(wd):                      # static slices of one staged value
        ddiag_ref[k] = skew_t[:, k + 1, :]

    # ---- wavefront soft-DTW recursion over anti-diagonals ----------------------
    big = f32(_BIG)
    inv_g = f32(1.0 / gamma)
    g = f32(gamma)
    lane_i = jax.lax.broadcasted_iota(jnp.int32, (b_blk, ldp), 1)
    is_lane0 = lane_i == 0                   # hoisted row-0 boundary mask
    not_lane0 = jnp.logical_not(is_lane0)    # hoisted

    def shift_down(v):                       # out[i] = v[i-1]; out[0] = BIG boundary
        return jnp.where(is_lane0, big, pltpu.roll(v, shift=1, axis=1))

    # diag_d[i] = R[i, d - i];  d = 0: R[0,0] = 0;  d = 1: all boundary (+inf).
    prev2 = jnp.where(is_lane0, f32(0.0), big)
    prev1 = jnp.full((b_blk, ldp), big, dtype=f32)

    def dp_step(dd, carry):
        p2, p1 = carry
        cost = ddiag_ref[dd - 2]             # contiguous (B_blk, LDP) load
        a = shift_down(p2)                   # R[i-1, j-1]
        b = shift_down(p1)                   # R[i-1, j]
        c = p1                               # R[i,   j-1]
        mmin = jnp.minimum(jnp.minimum(a, b), c)
        ssum = (jnp.exp((mmin - a) * inv_g)
                + jnp.exp((mmin - b) * inv_g)
                + jnp.exp((mmin - c) * inv_g))
        softmin = mmin - g * jnp.log(ssum)
        # Only the upper bound (i <= min(N, d-1)) plus lane 0 need masking: lanes
        # below the lower diagonal bound are never read by any valid lane.
        hi = jnp.minimum(n, dd - 1)
        valid = not_lane0 & (lane_i <= hi)
        new = jnp.where(valid, cost + softmin, big)
        return p1, new

    n_steps = n + m - 1
    loop_unroll = n_steps if n_steps <= 32 else 4
    _, final = jax.lax.fori_loop(2, n + m + 1, dp_step, (prev2, prev1),
                                 unroll=loop_unroll)

    # `final` is the last anti-diagonal (d = N + M); lane N holds R[N, M].
    # Store only the 128-lane chunk that contains lane N (unmasked full-tile vst).
    chunk0 = (n // 128) * 128
    out_ref[...] = final[:, chunk0:chunk0 + 128]


def dtw_loss(inputs, target, gamma=1.0, reduction="mean"):
    """JAX/Pallas equivalent of DTWLoss(gamma, reduction).forward(input, target)."""
    if gamma <= 0:
        raise ValueError("gamma must be > 0 for soft-DTW (gamma=0 hard DTW unsupported)")
    B, N, D = inputs.shape
    Bt, M, Dt = target.shape
    assert B == Bt and D == Dt, "batch / feature dims must match"

    b_pad8 = ((B + 7) // 8) * 8
    b_blk = min(_B_BLK_MAX, b_pad8)
    # v7x megacore: keep >= 2 grid steps when the batch is big enough.
    if b_pad8 == _B_BLK_MAX:
        b_blk = _B_BLK_MAX // 2
    b_pad = ((B + b_blk - 1) // b_blk) * b_blk
    grid = b_pad // b_blk

    ldp = ((N + 1 + 127) // 128) * 128       # DP lane width
    lsk = ((N + M + 127) // 128) * 128       # skew lane width
    wd = N + M - 1

    x = inputs.astype(jnp.float32)
    y = target.astype(jnp.float32)
    if b_pad != B:
        x = jnp.pad(x, ((0, b_pad - B), (0, 0), (0, 0)))
        y = jnp.pad(y, ((0, b_pad - B), (0, 0), (0, 0)))

    # Explicit VMEM budget: ddiag scratch + skew staging temps + I/O double buffers.
    vmem_est = 4 * (wd * b_blk * ldp
                    + 3 * b_blk * ldp * lsk
                    + 4 * b_blk * max(N, M) * D
                    + 2 * b_blk * 128)
    vmem_limit = int(min(100 * 2 ** 20, max(32 * 2 ** 20, int(1.5 * vmem_est))))

    out = pl.pallas_call(
        functools.partial(_soft_dtw_wavefront_kernel, gamma=float(gamma)),
        out_shape=jax.ShapeDtypeStruct((b_pad, 128), jnp.float32),
        grid=(grid,),
        in_specs=[
            pl.BlockSpec((b_blk, N, D), lambda g: (g, 0, 0)),
            pl.BlockSpec((b_blk, M, D), lambda g: (g, 0, 0)),
        ],
        out_specs=pl.BlockSpec((b_blk, 128), lambda g: (g, 0)),
        scratch_shapes=[pltpu.VMEM((wd, b_blk, ldp), jnp.float32)],
        compiler_params=pltpu.CompilerParams(
            dimension_semantics=("parallel",),
            vmem_limit_bytes=vmem_limit),
    )(x, y)

    per_sample = out[:B, N % 128]            # R[N, M] for each real batch row
    if reduction == "mean":
        return jnp.mean(per_sample)
    elif reduction == "sum":
        return jnp.sum(per_sample)
    else:
        raise ValueError("reduction must be 'mean' or 'sum'")


def _soft_dtw_reference(x, y, gamma):
    """Pure-numpy reference of soft-DTW (same math) for a sanity check."""
    x = np.asarray(x, dtype=np.float64)
    y = np.asarray(y, dtype=np.float64)
    B, N, _ = x.shape
    M = y.shape[1]
    losses = np.zeros(B)
    for b in range(B):
        delta = ((x[b][:, None, :] - y[b][None, :, :]) ** 2).sum(-1)
        R = np.full((N + 1, M + 1), _BIG)
        R[0, 0] = 0.0
        for i in range(1, N + 1):
            for j in range(1, M + 1):
                vals = np.array([R[i - 1, j - 1], R[i - 1, j], R[i, j - 1]])
                mm = vals.min()
                softmin = mm - gamma * np.log(np.exp(-(vals - mm) / gamma).sum())
                R[i, j] = delta[i - 1, j - 1] + softmin
        losses[b] = R[N, M]
    return losses.mean()


if __name__ == "__main__":
    key = jax.random.PRNGKey(0)
    k1, k2 = jax.random.split(key)

    B, N, M, D = 2, 8, 8, 4
    gamma = 1.0
    x = jax.random.normal(k1, (B, N, D), dtype=jnp.float32)   # input
    y = jax.random.normal(k2, (B, M, D), dtype=jnp.float32)   # target

    loss = jax.jit(functools.partial(dtw_loss, gamma=gamma, reduction="mean"))(x, y)
    loss = jax.block_until_ready(loss)

    ref = _soft_dtw_reference(np.asarray(x), np.asarray(y), gamma)
    assert np.isfinite(float(loss))
    assert abs(float(loss) - ref) < 1e-3 * max(1.0, abs(ref)), (float(loss), ref)

    print("KERNEL_OK")
</pallas_src>

<mosaic_0001>
module attributes {stable_mosaic.version = 11 : i64} {
  func.func @_soft_dtw_wavefront_kernel(%arg0: i32, %arg1: memref<8x8x4xf32, #tpu.memory_space<vmem>>, %arg2: memref<8x8x4xf32, #tpu.memory_space<vmem>>, %arg3: memref<8x128xf32, #tpu.memory_space<vmem>>, %arg4: memref<15x8x128xf32, #tpu.memory_space<vmem>>) attributes {dimension_semantics = [#tpu.dimension_semantics<parallel>], iteration_bounds = array<i64: 1>, scalar_prefetch = 0 : i64, scratch_operands = 1 : i64, tpu.core_type = #tpu.core_type<tc>, window_params = [{transform_indices = @transform_0, window_bounds = array<i64: 8, 8, 4>}, {transform_indices = @transform_1, window_bounds = array<i64: 8, 8, 4>}, {transform_indices = @transform_2, window_bounds = array<i64: 8, 128>}]} {
    %c0 = arith.constant 0 : index
    %c0_0 = arith.constant 0 : index
    %c0_1 = arith.constant 0 : index
    %0 = vector.load %arg1[%c0, %c0_0, %c0_1] : memref<8x8x4xf32, #tpu.memory_space<vmem>>, vector<8x8x4xf32>
    %c0_2 = arith.constant 0 : index
    %c0_3 = arith.constant 0 : index
    %c0_4 = arith.constant 0 : index
    %1 = vector.load %arg2[%c0_2, %c0_3, %c0_4] : memref<8x8x4xf32, #tpu.memory_space<vmem>>, vector<8x8x4xf32>
    %cst = arith.constant 0.000000e+00 : f32
    %2 = vector.broadcast %cst : f32 to vector<8x8x8xf32>
    %3 = vector.extract_strided_slice %0 {offsets = [0, 0, 0], sizes = [8, 8, 1], strides = [1, 1, 1]} : vector<8x8x4xf32> to vector<8x8x1xf32>
    %4 = vector.shape_cast %3 : vector<8x8x1xf32> to vector<8x8xf32>
    %5 = vector.shape_cast %4 : vector<8x8xf32> to vector<8x8x1xf32>
    %6 = vector.extract_strided_slice %1 {offsets = [0, 0, 0], sizes = [8, 8, 1], strides = [1, 1, 1]} : vector<8x8x4xf32> to vector<8x8x1xf32>
    %7 = vector.shape_cast %6 : vector<8x8x1xf32> to vector<8x8xf32>
    %8 = vector.shape_cast %7 : vector<8x8xf32> to vector<8x1x8xf32>
    %9 = vector.broadcast %5 : vector<8x8x1xf32> to vector<8x8x8xf32>
    %10 = vector.broadcast %8 : vector<8x1x8xf32> to vector<8x8x8xf32>
    %11 = arith.subf %9, %10 : vector<8x8x8xf32>
    %12 = arith.mulf %11, %11 : vector<8x8x8xf32>
    %13 = arith.addf %2, %12 : vector<8x8x8xf32>
    %14 = vector.extract_strided_slice %0 {offsets = [0, 0, 1], sizes = [8, 8, 1], strides = [1, 1, 1]} : vector<8x8x4xf32> to vector<8x8x1xf32>
    %15 = vector.shape_cast %14 : vector<8x8x1xf32> to vector<8x8xf32>
    %16 = vector.shape_cast %15 : vector<8x8xf32> to vector<8x8x1xf32>
    %17 = vector.extract_strided_slice %1 {offsets = [0, 0, 1], sizes = [8, 8, 1], strides = [1, 1, 1]} : vector<8x8x4xf32> to vector<8x8x1xf32>
    %18 = vector.shape_cast %17 : vector<8x8x1xf32> to vector<8x8xf32>
    %19 = vector.shape_cast %18 : vector<8x8xf32> to vector<8x1x8xf32>
    %20 = vector.broadcast %16 : vector<8x8x1xf32> to vector<8x8x8xf32>
    %21 = vector.broadcast %19 : vector<8x1x8xf32> to vector<8x8x8xf32>
    %22 = arith.subf %20, %21 : vector<8x8x8xf32>
    %23 = arith.mulf %22, %22 : vector<8x8x8xf32>
    %24 = arith.addf %13, %23 : vector<8x8x8xf32>
    %25 = vector.extract_strided_slice %0 {offsets = [0, 0, 2], sizes = [8, 8, 1], strides = [1, 1, 1]} : vector<8x8x4xf32> to vector<8x8x1xf32>
    %26 = vector.shape_cast %25 : vector<8x8x1xf32> to vector<8x8xf32>
    %27 = vector.shape_cast %26 : vector<8x8xf32> to vector<8x8x1xf32>
    %28 = vector.extract_strided_slice %1 {offsets = [0, 0, 2], sizes = [8, 8, 1], strides = [1, 1, 1]} : vector<8x8x4xf32> to vector<8x8x1xf32>
    %29 = vector.shape_cast %28 : vector<8x8x1xf32> to vector<8x8xf32>
    %30 = vector.shape_cast %29 : vector<8x8xf32> to vector<8x1x8xf32>
    %31 = vector.broadcast %27 : vector<8x8x1xf32> to vector<8x8x8xf32>
    %32 = vector.broadcast %30 : vector<8x1x8xf32> to vector<8x8x8xf32>
    %33 = arith.subf %31, %32 : vector<8x8x8xf32>
    %34 = arith.mulf %33, %33 : vector<8x8x8xf32>
    %35 = arith.addf %24, %34 : vector<8x8x8xf32>
    %36 = vector.extract_strided_slice %0 {offsets = [0, 0, 3], sizes = [8, 8, 1], strides = [1, 1, 1]} : vector<8x8x4xf32> to vector<8x8x1xf32>
    %37 = vector.shape_cast %36 : vector<8x8x1xf32> to vector<8x8xf32>
    %38 = vector.shape_cast %37 : vector<8x8xf32> to vector<8x8x1xf32>
    %39 = vector.extract_strided_slice %1 {offsets = [0, 0, 3], sizes = [8, 8, 1], strides = [1, 1, 1]} : vector<8x8x4xf32> to vector<8x8x1xf32>
    %40 = vector.shape_cast %39 : vector<8x8x1xf32> to vector<8x8xf32>
    %41 = vector.shape_cast %40 : vector<8x8xf32> to vector<8x1x8xf32>
    %42 = vector.broadcast %38 : vector<8x8x1xf32> to vector<8x8x8xf32>
    %43 = vector.broadcast %41 : vector<8x1x8xf32> to vector<8x8x8xf32>
    %44 = arith.subf %42, %43 : vector<8x8x8xf32>
    %45 = arith.mulf %44, %44 : vector<8x8x8xf32>
    %46 = arith.addf %35, %45 : vector<8x8x8xf32>
    %c0_i32 = arith.constant 0 : i32
    %47 = arith.sitofp %c0_i32 : i32 to f32
    %48 = vector.broadcast %47 : f32 to vector<8x8x120xf32>
    %49 = tpu.concatenate %46, %48 in 2 : vector<8x8x8xf32>, vector<8x8x120xf32> -> vector<8x8x128xf32>
    %50 = vector.extract_strided_slice %49 {offsets = [0, 0, 0], sizes = [1, 8, 128], strides = [1, 1, 1]} : vector<8x8x128xf32> to vector<1x8x128xf32>
    %51 = vector.shape_cast %50 : vector<1x8x128xf32> to vector<8x128xf32>
    %c1_i32 = arith.constant 1 : i32
    %52 = tpu.dynamic_rotate %51 by %c1_i32 dim 1 {stride = 1 : si32, stride_dimension = 0 : si32} : vector<8x128xf32>, i32 -> vector<8x128xf32>
    %53 = vector.extract_strided_slice %49 {offsets = [1, 0, 0], sizes = [1, 8, 128], strides = [1, 1, 1]} : vector<8x8x128xf32> to vector<1x8x128xf32>
    %54 = vector.shape_cast %53 : vector<1x8x128xf32> to vector<8x128xf32>
    %c1_i32_5 = arith.constant 1 : i32
    %55 = tpu.dynamic_rotate %54 by %c1_i32_5 dim 1 {stride = 1 : si32, stride_dimension = 0 : si32} : vector<8x128xf32>, i32 -> vector<8x128xf32>
    %56 = vector.extract_strided_slice %49 {offsets = [2, 0, 0], sizes = [1, 8, 128], strides = [1, 1, 1]} : vector<8x8x128xf32> to vector<1x8x128xf32>
    %57 = vector.shape_cast %56 : vector<1x8x128xf32> to vector<8x128xf32>
    %c1_i32_6 = arith.constant 1 : i32
    %58 = tpu.dynamic_rotate %57 by %c1_i32_6 dim 1 {stride = 1 : si32, stride_dimension = 0 : si32} : vector<8x128xf32>, i32 -> vector<8x128xf32>
    %59 = vector.extract_strided_slice %49 {offsets = [3, 0, 0], sizes = [1, 8, 128], strides = [1, 1, 1]} : vector<8x8x128xf32> to vector<1x8x128xf32>
    %60 = vector.shape_cast %59 : vector<1x8x128xf32> to vector<8x128xf32>
    %c1_i32_7 = arith.constant 1 : i32
    %61 = tpu.dynamic_rotate %60 by %c1_i32_7 dim 1 {stride = 1 : si32, stride_dimension = 0 : si32} : vector<8x128xf32>, i32 -> vector<8x128xf32>
    %62 = vector.extract_strided_slice %49 {offsets = [4, 0, 0], sizes = [1, 8, 128], strides = [1, 1, 1]} : vector<8x8x128xf32> to vector<1x8x128xf32>
    %63 = vector.shape_cast %62 : vector<1x8x128xf32> to vector<8x128xf32>
    %c1_i32_8 = arith.constant 1 : i32
    %64 = tpu.dynamic_rotate %63 by %c1_i32_8 dim 1 {stride = 1 : si32, stride_dimension = 0 : si32} : vector<8x128xf32>, i32 -> vector<8x128xf32>
    %65 = vector.extract_strided_slice %49 {offsets = [5, 0, 0], sizes = [1, 8, 128], strides = [1, 1, 1]} : vector<8x8x128xf32> to vector<1x8x128xf32>
    %66 = vector.shape_cast %65 : vector<1x8x128xf32> to vector<8x128xf32>
    %c1_i32_9 = arith.constant 1 : i32
    %67 = tpu.dynamic_rotate %66 by %c1_i32_9 dim 1 {stride = 1 : si32, stride_dimension = 0 : si32} : vector<8x128xf32>, i32 -> vector<8x128xf32>
    %68 = vector.extract_strided_slice %49 {offsets = [6, 0, 0], sizes = [1, 8, 128], strides = [1, 1, 1]} : vector<8x8x128xf32> to vector<1x8x128xf32>
    %69 = vector.shape_cast %68 : vector<1x8x128xf32> to vector<8x128xf32>
    %c1_i32_10 = arith.constant 1 : i32
    %70 = tpu.dynamic_rotate %69 by %c1_i32_10 dim 1 {stride = 1 : si32, stride_dimension = 0 : si32} : vector<8x128xf32>, i32 -> vector<8x128xf32>
    %71 = vector.extract_strided_slice %49 {offsets = [7, 0, 0], sizes = [1, 8, 128], strides = [1, 1, 1]} : vector<8x8x128xf32> to vector<1x8x128xf32>
    %72 = vector.shape_cast %71 : vector<1x8x128xf32> to vector<8x128xf32>
    %c1_i32_11 = arith.constant 1 : i32
    %73 = tpu.dynamic_rotate %72 by %c1_i32_11 dim 1 {stride = 1 : si32, stride_dimension = 0 : si32} : vector<8x128xf32>, i32 -> vector<8x128xf32>
    %74 = vector.shape_cast %52 : vector<8x128xf32> to vector<1x8x128xf32>
    %75 = vector.shape_cast %55 : vector<8x128xf32> to vector<1x8x128xf32>
    %76 = vector.shape_cast %58 : vector<8x128xf32> to vector<1x8x128xf32>
    %77 = vector.shape_cast %61 : vector<8x128xf32> to vector<1x8x128xf32>
    %78 = vector.shape_cast %64 : vector<8x128xf32> to vector<1x8x128xf32>
    %79 = vector.shape_cast %67 : vector<8x128xf32> to vector<1x8x128xf32>
    %80 = vector.shape_cast %70 : vector<8x128xf32> to vector<1x8x128xf32>
    %81 = vector.shape_cast %73 : vector<8x128xf32> to vector<1x8x128xf32>
    %82 = tpu.concatenate %74, %75, %76, %77, %78, %79, %80, %81 in 0 : vector<1x8x128xf32>, vector<1x8x128xf32>, vector<1x8x128xf32>, vector<1x8x128xf32>, vector<1x8x128xf32>, vector<1x8x128xf32>, vector<1x8x128xf32>, vector<1x8x128xf32> -> vector<8x8x128xf32>
    %c0_i32_12 = arith.constant 0 : i32
    %83 = arith.sitofp %c0_i32_12 : i32 to f32
    %84 = vector.broadcast %83 : f32 to vector<8x1x128xf32>
    %85 = tpu.concatenate %84, %82 in 1 : vector<8x1x128xf32>, vector<8x8x128xf32> -> vector<8x9x128xf32>
    %86 = vector.broadcast %83 : f32 to vector<8x119x128xf32>
    %87 = tpu.concatenate %85, %86 in 1 : vector<8x9x128xf32>, vector<8x119x128xf32> -> vector<8x128x128xf32>
    %88 = tpu.transpose %87, [0, 2, 1] : vector<8x128x128xf32> -> vector<8x128x128xf32>
    %89 = vector.extract_strided_slice %88 {offsets = [0, 1, 0], sizes = [8, 1, 128], strides = [1, 1, 1]} : vector<8x128x128xf32> to vector<8x1x128xf32>
    %90 = vector.shape_cast %89 : vector<8x1x128xf32> to vector<8x128xf32>
    %c0_13 = arith.constant 0 : index
    %c0_14 = arith.constant 0 : index
    %c0_15 = arith.constant 0 : index
    %91 = vector.load %arg4[%c0_13, %c0_14, %c0_15] : memref<15x8x128xf32, #tpu.memory_space<vmem>>, vector<1x8x128xf32>
    %92 = vector.shape_cast %91 : vector<1x8x128xf32> to vector<8x128xf32>
    %93 = vector.shape_cast %90 : vector<8x128xf32> to vector<1x8x128xf32>
    tpu.vector_store %arg4[%c0_13, %c0_14, %c0_15], %93 {strides = array<i32>} : memref<15x8x128xf32, #tpu.memory_space<vmem>>, vector<1x8x128xf32>,
    %94 = vector.extract_strided_slice %88 {offsets = [0, 2, 0], sizes = [8, 1, 128], strides = [1, 1, 1]} : vector<8x128x128xf32> to vector<8x1x128xf32>
    %95 = vector.shape_cast %94 : vector<8x1x128xf32> to vector<8x128xf32>
    %c1 = arith.constant 1 : index
    %c0_16 = arith.constant 0 : index
    %c0_17 = arith.constant 0 : index
    %96 = vector.load %arg4[%c1, %c0_16, %c0_17] : memref<15x8x128xf32, #tpu.memory_space<vmem>>, vector<1x8x128xf32>
    %97 = vector.shape_cast %96 : vector<1x8x128xf32> to vector<8x128xf32>
    %98 = vector.shape_cast %95 : vector<8x128xf32> to vector<1x8x128xf32>
    tpu.vector_store %arg4[%c1, %c0_16, %c0_17], %98 {strides = array<i32>} : memref<15x8x128xf32, #tpu.memory_space<vmem>>, vector<1x8x128xf32>,
    %99 = vector.extract_strided_slice %88 {offsets = [0, 3, 0], sizes = [8, 1, 128], strides = [1, 1, 1]} : vector<8x128x128xf32> to vector<8x1x128xf32>
    %100 = vector.shape_cast %99 : vector<8x1x128xf32> to vector<8x128xf32>
    %c2 = arith.constant 2 : index
    %c0_18 = arith.constant 0 : index
    %c0_19 = arith.constant 0 : index
    %101 = vector.load %arg4[%c2, %c0_18, %c0_19] : memref<15x8x128xf32, #tpu.memory_space<vmem>>, vector<1x8x128xf32>
    %102 = vector.shape_cast %101 : vector<1x8x128xf32> to vector<8x128xf32>
    %103 = vector.shape_cast %100 : vector<8x128xf32> to vector<1x8x128xf32>
    tpu.vector_store %arg4[%c2, %c0_18, %c0_19], %103 {strides = array<i32>} : memref<15x8x128xf32, #tpu.memory_space<vmem>>, vector<1x8x128xf32>,
    %104 = vector.extract_strided_slice %88 {offsets = [0, 4, 0], sizes = [8, 1, 128], strides = [1, 1, 1]} : vector<8x128x128xf32> to vector<8x1x128xf32>
    %105 = vector.shape_cast %104 : vector<8x1x128xf32> to vector<8x128xf32>
    %c3 = arith.constant 3 : index
    %c0_20 = arith.constant 0 : index
    %c0_21 = arith.constant 0 : index
    %106 = vector.load %arg4[%c3, %c0_20, %c0_21] : memref<15x8x128xf32, #tpu.memory_space<vmem>>, vector<1x8x128xf32>
    %107 = vector.shape_cast %106 : vector<1x8x128xf32> to vector<8x128xf32>
    %108 = vector.shape_cast %105 : vector<8x128xf32> to vector<1x8x128xf32>
    tpu.vector_store %arg4[%c3, %c0_20, %c0_21], %108 {strides = array<i32>} : memref<15x8x128xf32, #tpu.memory_space<vmem>>, vector<1x8x128xf32>,
    %109 = vector.extract_strided_slice %88 {offsets = [0, 5, 0], sizes = [8, 1, 128], strides = [1, 1, 1]} : vector<8x128x128xf32> to vector<8x1x128xf32>
    %110 = vector.shape_cast %109 : vector<8x1x128xf32> to vector<8x128xf32>
    %c4 = arith.constant 4 : index
    %c0_22 = arith.constant 0 : index
    %c0_23 = arith.constant 0 : index
    %111 = vector.load %arg4[%c4, %c0_22, %c0_23] : memref<15x8x128xf32, #tpu.memory_space<vmem>>, vector<1x8x128xf32>
    %112 = vector.shape_cast %111 : vector<1x8x128xf32> to vector<8x128xf32>
    %113 = vector.shape_cast %110 : vector<8x128xf32> to vector<1x8x128xf32>
    tpu.vector_store %arg4[%c4, %c0_22, %c0_23], %113 {strides = array<i32>} : memref<15x8x128xf32, #tpu.memory_space<vmem>>, vector<1x8x128xf32>,
    %114 = vector.extract_strided_slice %88 {offsets = [0, 6, 0], sizes = [8, 1, 128], strides = [1, 1, 1]} : vector<8x128x128xf32> to vector<8x1x128xf32>
    %115 = vector.shape_cast %114 : vector<8x1x128xf32> to vector<8x128xf32>
    %c5 = arith.constant 5 : index
    %c0_24 = arith.constant 0 : index
    %c0_25 = arith.constant 0 : index
    %116 = vector.load %arg4[%c5, %c0_24, %c0_25] : memref<15x8x128xf32, #tpu.memory_space<vmem>>, vector<1x8x128xf32>
    %117 = vector.shape_cast %116 : vector<1x8x128xf32> to vector<8x128xf32>
    %118 = vector.shape_cast %115 : vector<8x128xf32> to vector<1x8x128xf32>
    tpu.vector_store %arg4[%c5, %c0_24, %c0_25], %118 {strides = array<i32>} : memref<15x8x128xf32, #tpu.memory_space<vmem>>, vector<1x8x128xf32>,
    %119 = vector.extract_strided_slice %88 {offsets = [0, 7, 0], sizes = [8, 1, 128], strides = [1, 1, 1]} : vector<8x128x128xf32> to vector<8x1x128xf32>
    %120 = vector.shape_cast %119 : vector<8x1x128xf32> to vector<8x128xf32>
    %c6 = arith.constant 6 : index
    %c0_26 = arith.constant 0 : index
    %c0_27 = arith.constant 0 : index
    %121 = vector.load %arg4[%c6, %c0_26, %c0_27] : memref<15x8x128xf32, #tpu.memory_space<vmem>>, vector<1x8x128xf32>
    %122 = vector.shape_cast %121 : vector<1x8x128xf32> to vector<8x128xf32>
    %123 = vector.shape_cast %120 : vector<8x128xf32> to vector<1x8x128xf32>
    tpu.vector_store %arg4[%c6, %c0_26, %c0_27], %123 {strides = array<i32>} : memref<15x8x128xf32, #tpu.memory_space<vmem>>, vector<1x8x128xf32>,
    %124 = vector.extract_strided_slice %88 {offsets = [0, 8, 0], sizes = [8, 1, 128], strides = [1, 1, 1]} : vector<8x128x128xf32> to vector<8x1x128xf32>
    %125 = vector.shape_cast %124 : vector<8x1x128xf32> to vector<8x128xf32>
    %c7 = arith.constant 7 : index
    %c0_28 = arith.constant 0 : index
    %c0_29 = arith.constant 0 : index
    %126 = vector.load %arg4[%c7, %c0_28, %c0_29] : memref<15x8x128xf32, #tpu.memory_space<vmem>>, vector<1x8x128xf32>
    %127 = vector.shape_cast %126 : vector<1x8x128xf32> to vector<8x128xf32>
    %128 = vector.shape_cast %125 : vector<8x128xf32> to vector<1x8x128xf32>
    tpu.vector_store %arg4[%c7, %c0_28, %c0_29], %128 {strides = array<i32>} : memref<15x8x128xf32, #tpu.memory_space<vmem>>, vector<1x8x128xf32>,
    %129 = vector.extract_strided_slice %88 {offsets = [0, 9, 0], sizes = [8, 1, 128], strides = [1, 1, 1]} : vector<8x128x128xf32> to vector<8x1x128xf32>
    %130 = vector.shape_cast %129 : vector<8x1x128xf32> to vector<8x128xf32>
    %c8 = arith.constant 8 : index
    %c0_30 = arith.constant 0 : index
    %c0_31 = arith.constant 0 : index
    %131 = vector.load %arg4[%c8, %c0_30, %c0_31] : memref<15x8x128xf32, #tpu.memory_space<vmem>>, vector<1x8x128xf32>
    %132 = vector.shape_cast %131 : vector<1x8x128xf32> to vector<8x128xf32>
    %133 = vector.shape_cast %130 : vector<8x128xf32> to vector<1x8x128xf32>
    tpu.vector_store %arg4[%c8, %c0_30, %c0_31], %133 {strides = array<i32>} : memref<15x8x128xf32, #tpu.memory_space<vmem>>, vector<1x8x128xf32>,
    %134 = vector.extract_strided_slice %88 {offsets = [0, 10, 0], sizes = [8, 1, 128], strides = [1, 1, 1]} : vector<8x128x128xf32> to vector<8x1x128xf32>
    %135 = vector.shape_cast %134 : vector<8x1x128xf32> to vector<8x128xf32>
    %c9 = arith.constant 9 : index
    %c0_32 = arith.constant 0 : index
    %c0_33 = arith.constant 0 : index
    %136 = vector.load %arg4[%c9, %c0_32, %c0_33] : memref<15x8x128xf32, #tpu.memory_space<vmem>>, vector<1x8x128xf32>
    %137 = vector.shape_cast %136 : vector<1x8x128xf32> to vector<8x128xf32>
    %138 = vector.shape_cast %135 : vector<8x128xf32> to vector<1x8x128xf32>
    tpu.vector_store %arg4[%c9, %c0_32, %c0_33], %138 {strides = array<i32>} : memref<15x8x128xf32, #tpu.memory_space<vmem>>, vector<1x8x128xf32>,
    %139 = vector.extract_strided_slice %88 {offsets = [0, 11, 0], sizes = [8, 1, 128], strides = [1, 1, 1]} : vector<8x128x128xf32> to vector<8x1x128xf32>
    %140 = vector.shape_cast %139 : vector<8x1x128xf32> to vector<8x128xf32>
    %c10 = arith.constant 10 : index
    %c0_34 = arith.constant 0 : index
    %c0_35 = arith.constant 0 : index
    %141 = vector.load %arg4[%c10, %c0_34, %c0_35] : memref<15x8x128xf32, #tpu.memory_space<vmem>>, vector<1x8x128xf32>
    %142 = vector.shape_cast %141 : vector<1x8x128xf32> to vector<8x128xf32>
    %143 = vector.shape_cast %140 : vector<8x128xf32> to vector<1x8x128xf32>
    tpu.vector_store %arg4[%c10, %c0_34, %c0_35], %143 {strides = array<i32>} : memref<15x8x128xf32, #tpu.memory_space<vmem>>, vector<1x8x128xf32>,
    %144 = vector.extract_strided_slice %88 {offsets = [0, 12, 0], sizes = [8, 1, 128], strides = [1, 1, 1]} : vector<8x128x128xf32> to vector<8x1x128xf32>
    %145 = vector.shape_cast %144 : vector<8x1x128xf32> to vector<8x128xf32>
    %c11 = arith.constant 11 : index
    %c0_36 = arith.constant 0 : index
    %c0_37 = arith.constant 0 : index
    %146 = vector.load %arg4[%c11, %c0_36, %c0_37] : memref<15x8x128xf32, #tpu.memory_space<vmem>>, vector<1x8x128xf32>
    %147 = vector.shape_cast %146 : vector<1x8x128xf32> to vector<8x128xf32>
    %148 = vector.shape_cast %145 : vector<8x128xf32> to vector<1x8x128xf32>
    tpu.vector_store %arg4[%c11, %c0_36, %c0_37], %148 {strides = array<i32>} : memref<15x8x128xf32, #tpu.memory_space<vmem>>, vector<1x8x128xf32>,
    %149 = vector.extract_strided_slice %88 {offsets = [0, 13, 0], sizes = [8, 1, 128], strides = [1, 1, 1]} : vector<8x128x128xf32> to vector<8x1x128xf32>
    %150 = vector.shape_cast %149 : vector<8x1x128xf32> to vector<8x128xf32>
    %c12 = arith.constant 12 : index
    %c0_38 = arith.constant 0 : index
    %c0_39 = arith.constant 0 : index
    %151 = vector.load %arg4[%c12, %c0_38, %c0_39] : memref<15x8x128xf32, #tpu.memory_space<vmem>>, vector<1x8x128xf32>
    %152 = vector.shape_cast %151 : vector<1x8x128xf32> to vector<8x128xf32>
    %153 = vector.shape_cast %150 : vector<8x128xf32> to vector<1x8x128xf32>
    tpu.vector_store %arg4[%c12, %c0_38, %c0_39], %153 {strides = array<i32>} : memref<15x8x128xf32, #tpu.memory_space<vmem>>, vector<1x8x128xf32>,
    %154 = vector.extract_strided_slice %88 {offsets = [0, 14, 0], sizes = [8, 1, 128], strides = [1, 1, 1]} : vector<8x128x128xf32> to vector<8x1x128xf32>
    %155 = vector.shape_cast %154 : vector<8x1x128xf32> to vector<8x128xf32>
    %c13 = arith.constant 13 : index
    %c0_40 = arith.constant 0 : index
    %c0_41 = arith.constant 0 : index
    %156 = vector.load %arg4[%c13, %c0_40, %c0_41] : memref<15x8x128xf32, #tpu.memory_space<vmem>>, vector<1x8x128xf32>
    %157 = vector.shape_cast %156 : vector<1x8x128xf32> to vector<8x128xf32>
    %158 = vector.shape_cast %155 : vector<8x128xf32> to vector<1x8x128xf32>
    tpu.vector_store %arg4[%c13, %c0_40, %c0_41], %158 {strides = array<i32>} : memref<15x8x128xf32, #tpu.memory_space<vmem>>, vector<1x8x128xf32>,
    %159 = vector.extract_strided_slice %88 {offsets = [0, 15, 0], sizes = [8, 1, 128], strides = [1, 1, 1]} : vector<8x128x128xf32> to vector<8x1x128xf32>
    %160 = vector.shape_cast %159 : vector<8x1x128xf32> to vector<8x128xf32>
    %c14 = arith.constant 14 : index
    %c0_42 = arith.constant 0 : index
    %c0_43 = arith.constant 0 : index
    %161 = vector.load %arg4[%c14, %c0_42, %c0_43] : memref<15x8x128xf32, #tpu.memory_space<vmem>>, vector<1x8x128xf32>
    %162 = vector.shape_cast %161 : vector<1x8x128xf32> to vector<8x128xf32>
    %163 = vector.shape_cast %160 : vector<8x128xf32> to vector<1x8x128xf32>
    tpu.vector_store %arg4[%c14, %c0_42, %c0_43], %163 {strides = array<i32>} : memref<15x8x128xf32, #tpu.memory_space<vmem>>, vector<1x8x128xf32>,
    %164 = tpu.iota {dimensions = array<i32: 1>} : vector<8x128xi32>
    %c0_i32_44 = arith.constant 0 : i32
    %165 = vector.broadcast %c0_i32_44 : i32 to vector<8x128xi32>
    %166 = arith.cmpi eq, %164, %165 : vector<8x128xi32>
    %cst_45 = arith.constant dense<true> : vector<8x128xi1>
    %167 = arith.xori %166, %cst_45 : vector<8x128xi1>
    %cst_46 = arith.constant 0.000000e+00 : f32
    %cst_47 = arith.constant 1.000000e+30 : f32
    %168 = vector.broadcast %cst_46 : f32 to vector<8x128xf32>
    %169 = vector.broadcast %cst_47 : f32 to vector<8x128xf32>
    %170 = arith.select %166, %168, %169 : vector<8x128xi1>, vector<8x128xf32>
    %cst_48 = arith.constant 1.000000e+30 : f32
    %171 = vector.broadcast %cst_48 : f32 to vector<8x128xf32>
    %cst_49 = arith.constant 1.000000e+30 : f32
    %cst_50 = arith.constant 1.000000e+00 : f32
    %cst_51 = arith.constant 1.000000e+00 : f32
    %c2_i32 = arith.constant 2 : i32
    %c2_i32_52 = arith.constant 2 : i32
    %172 = arith.subi %c2_i32, %c2_i32_52 : i32
    %173 = arith.index_cast %172 : i32 to index
    %c0_53 = arith.constant 0 : index
    %c0_54 = arith.constant 0 : index
    %174 = vector.load %arg4[%173, %c0_53, %c0_54] : memref<15x8x128xf32, #tpu.memory_space<vmem>>, vector<1x8x128xf32>
    %175 = vector.shape_cast %174 : vector<1x8x128xf32> to vector<8x128xf32>
    %c1_i32_55 = arith.constant 1 : i32
    %176 = tpu.dynamic_rotate %170 by %c1_i32_55 dim 1 : vector<8x128xf32>, i32 -> vector<8x128xf32>
    %177 = vector.broadcast %cst_49 : f32 to vector<8x128xf32>
    %178 = arith.select %166, %177, %176 : vector<8x128xi1>, vector<8x128xf32>
    %c1_i32_56 = arith.constant 1 : i32
    %179 = tpu.dynamic_rotate %171 by %c1_i32_56 dim 1 : vector<8x128xf32>, i32 -> vector<8x128xf32>
    %180 = vector.broadcast %cst_49 : f32 to vector<8x128xf32>
    %181 = arith.select %166, %180, %179 : vector<8x128xi1>, vector<8x128xf32>
    %182 = arith.minimumf %178, %181 : vector<8x128xf32>
    %183 = arith.minimumf %182, %171 : vector<8x128xf32>
    %184 = arith.subf %183, %178 : vector<8x128xf32>
    %185 = vector.broadcast %cst_50 : f32 to vector<8x128xf32>
    %186 = arith.mulf %184, %185 : vector<8x128xf32>
    %187 = math.exp %186 : vector<8x128xf32>
    %188 = arith.subf %183, %181 : vector<8x128xf32>
    %189 = vector.broadcast %cst_50 : f32 to vector<8x128xf32>
    %190 = arith.mulf %188, %189 : vector<8x128xf32>
    %191 = math.exp %190 : vector<8x128xf32>
    %192 = arith.addf %187, %191 : vector<8x128xf32>
    %193 = arith.subf %183, %171 : vector<8x128xf32>
    %194 = vector.broadcast %cst_50 : f32 to vector<8x128xf32>
    %195 = arith.mulf %193, %194 : vector<8x128xf32>
    %196 = math.exp %195 : vector<8x128xf32>
    %197 = arith.addf %192, %196 : vector<8x128xf32>
    %198 = math.log %197 : vector<8x128xf32>
    %199 = vector.broadcast %cst_51 : f32 to vector<8x128xf32>
    %200 = arith.mulf %199, %198 : vector<8x128xf32>
    %201 = arith.subf %183, %200 : vector<8x128xf32>
    %c1_i32_57 = arith.constant 1 : i32
    %202 = arith.subi %c2_i32, %c1_i32_57 : i32
    %c8_i32 = arith.constant 8 : i32
    %203 = arith.minsi %c8_i32, %202 : i32
    %204 = vector.broadcast %203 : i32 to vector<8x128xi32>
    %205 = arith.cmpi sle, %164, %204 : vector<8x128xi32>
    %206 = arith.andi %167, %205 : vector<8x128xi1>
    %207 = arith.addf %175, %201 : vector<8x128xf32>
    %208 = vector.broadcast %cst_49 : f32 to vector<8x128xf32>
    %209 = arith.select %206, %207, %208 : vector<8x128xi1>, vector<8x128xf32>
    %c3_i32 = arith.constant 3 : i32
    %c2_i32_58 = arith.constant 2 : i32
    %210 = arith.subi %c3_i32, %c2_i32_58 : i32
    %211 = arith.index_cast %210 : i32 to index
    %c0_59 = arith.constant 0 : index
    %c0_60 = arith.constant 0 : index
    %212 = vector.load %arg4[%211, %c0_59, %c0_60] : memref<15x8x128xf32, #tpu.memory_space<vmem>>, vector<1x8x128xf32>
    %213 = vector.shape_cast %212 : vector<1x8x128xf32> to vector<8x128xf32>
    %c1_i32_61 = arith.constant 1 : i32
    %214 = tpu.dynamic_rotate %171 by %c1_i32_61 dim 1 : vector<8x128xf32>, i32 -> vector<8x128xf32>
    %215 = vector.broadcast %cst_49 : f32 to vector<8x128xf32>
    %216 = arith.select %166, %215, %214 : vector<8x128xi1>, vector<8x128xf32>
    %c1_i32_62 = arith.constant 1 : i32
    %217 = tpu.dynamic_rotate %209 by %c1_i32_62 dim 1 : vector<8x128xf32>, i32 -> vector<8x128xf32>
    %218 = vector.broadcast %cst_49 : f32 to vector<8x128xf32>
    %219 = arith.select %166, %218, %217 : vector<8x128xi1>, vector<8x128xf32>
    %220 = arith.minimumf %216, %219 : vector<8x128xf32>
    %221 = arith.minimumf %220, %209 : vector<8x128xf32>
    %222 = arith.subf %221, %216 : vector<8x128xf32>
    %223 = vector.broadcast %cst_50 : f32 to vector<8x128xf32>
    %224 = arith.mulf %222, %223 : vector<8x128xf32>
    %225 = math.exp %224 : vector<8x128xf32>
    %226 = arith.subf %221, %219 : vector<8x128xf32>
    %227 = vector.broadcast %cst_50 : f32 to vector<8x128xf32>
    %228 = arith.mulf %226, %227 : vector<8x128xf32>
    %229 = math.exp %228 : vector<8x128xf32>
    %230 = arith.addf %225, %229 : vector<8x128xf32>
    %231 = arith.subf %221, %209 : vector<8x128xf32>
    %232 = vector.broadcast %cst_50 : f32 to vector<8x128xf32>
    %233 = arith.mulf %231, %232 : vector<8x128xf32>
    %234 = math.exp %233 : vector<8x128xf32>
    %235 = arith.addf %230, %234 : vector<8x128xf32>
    %236 = math.log %235 : vector<8x128xf32>
    %237 = vector.broadcast %cst_51 : f32 to vector<8x128xf32>
    %238 = arith.mulf %237, %236 : vector<8x128xf32>
    %239 = arith.subf %221, %238 : vector<8x128xf32>
    %c1_i32_63 = arith.constant 1 : i32
    %240 = arith.subi %c3_i32, %c1_i32_63 : i32
    %c8_i32_64 = arith.constant 8 : i32
    %241 = arith.minsi %c8_i32_64, %240 : i32
    %242 = vector.broadcast %241 : i32 to vector<8x128xi32>
    %243 = arith.cmpi sle, %164, %242 : vector<8x128xi32>
    %244 = arith.andi %167, %243 : vector<8x128xi1>
    %245 = arith.addf %213, %239 : vector<8x128xf32>
    %246 = vector.broadcast %cst_49 : f32 to vector<8x128xf32>
    %247 = arith.select %244, %245, %246 : vector<8x128xi1>, vector<8x128xf32>
    %c4_i32 = arith.constant 4 : i32
    %c2_i32_65 = arith.constant 2 : i32
    %248 = arith.subi %c4_i32, %c2_i32_65 : i32
    %249 = arith.index_cast %248 : i32 to index
    %c0_66 = arith.constant 0 : index
    %c0_67 = arith.constant 0 : index
    %250 = vector.load %arg4[%249, %c0_66, %c0_67] : memref<15x8x128xf32, #tpu.memory_space<vmem>>, vector<1x8x128xf32>
    %251 = vector.shape_cast %250 : vector<1x8x128xf32> to vector<8x128xf32>
    %c1_i32_68 = arith.constant 1 : i32
    %252 = tpu.dynamic_rotate %209 by %c1_i32_68 dim 1 : vector<8x128xf32>, i32 -> vector<8x128xf32>
    %253 = vector.broadcast %cst_49 : f32 to vector<8x128xf32>
    %254 = arith.select %166, %253, %252 : vector<8x128xi1>, vector<8x128xf32>
    %c1_i32_69 = arith.constant 1 : i32
    %255 = tpu.dynamic_rotate %247 by %c1_i32_69 dim 1 : vector<8x128xf32>, i32 -> vector<8x128xf32>
    %256 = vector.broadcast %cst_49 : f32 to vector<8x128xf32>
    %257 = arith.select %166, %256, %255 : vector<8x128xi1>, vector<8x128xf32>
    %258 = arith.minimumf %254, %257 : vector<8x128xf32>
    %259 = arith.minimumf %258, %247 : vector<8x128xf32>
    %260 = arith.subf %259, %254 : vector<8x128xf32>
    %261 = vector.broadcast %cst_50 : f32 to vector<8x128xf32>
    %262 = arith.mulf %260, %261 : vector<8x128xf32>
    %263 = math.exp %262 : vector<8x128xf32>
    %264 = arith.subf %259, %257 : vector<8x128xf32>
    %265 = vector.broadcast %cst_50 : f32 to vector<8x128xf32>
    %266 = arith.mulf %264, %265 : vector<8x128xf32>
    %267 = math.exp %266 : vector<8x128xf32>
    %268 = arith.addf %263, %267 : vector<8x128xf32>
    %269 = arith.subf %259, %247 : vector<8x128xf32>
    %270 = vector.broadcast %cst_50 : f32 to vector<8x128xf32>
    %271 = arith.mulf %269, %270 : vector<8x128xf32>
    %272 = math.exp %271 : vector<8x128xf32>
    %273 = arith.addf %268, %272 : vector<8x128xf32>
    %274 = math.log %273 : vector<8x128xf32>
    %275 = vector.broadcast %cst_51 : f32 to vector<8x128xf32>
    %276 = arith.mulf %275, %274 : vector<8x128xf32>
    %277 = arith.subf %259, %276 : vector<8x128xf32>
    %c1_i32_70 = arith.constant 1 : i32
    %278 = arith.subi %c4_i32, %c1_i32_70 : i32
    %c8_i32_71 = arith.constant 8 : i32
    %279 = arith.minsi %c8_i32_71, %278 : i32
    %280 = vector.broadcast %279 : i32 to vector<8x128xi32>
    %281 = arith.cmpi sle, %164, %280 : vector<8x128xi32>
    %282 = arith.andi %167, %281 : vector<8x128xi1>
    %283 = arith.addf %251, %277 : vector<8x128xf32>
    %284 = vector.broadcast %cst_49 : f32 to vector<8x128xf32>
    %285 = arith.select %282, %283, %284 : vector<8x128xi1>, vector<8x128xf32>
    %c5_i32 = arith.constant 5 : i32
    %c2_i32_72 = arith.constant 2 : i32
    %286 = arith.subi %c5_i32, %c2_i32_72 : i32
    %287 = arith.index_cast %286 : i32 to index
    %c0_73 = arith.constant 0 : index
    %c0_74 = arith.constant 0 : index
    %288 = vector.load %arg4[%287, %c0_73, %c0_74] : memref<15x8x128xf32, #tpu.memory_space<vmem>>, vector<1x8x128xf32>
    %289 = vector.shape_cast %288 : vector<1x8x128xf32> to vector<8x128xf32>
    %c1_i32_75 = arith.constant 1 : i32
    %290 = tpu.dynamic_rotate %247 by %c1_i32_75 dim 1 : vector<8x128xf32>, i32 -> vector<8x128xf32>
    %291 = vector.broadcast %cst_49 : f32 to vector<8x128xf32>
    %292 = arith.select %166, %291, %290 : vector<8x128xi1>, vector<8x128xf32>
    %c1_i32_76 = arith.constant 1 : i32
    %293 = tpu.dynamic_rotate %285 by %c1_i32_76 dim 1 : vector<8x128xf32>, i32 -> vector<8x128xf32>
    %294 = vector.broadcast %cst_49 : f32 to vector<8x128xf32>
    %295 = arith.select %166, %294, %293 : vector<8x128xi1>, vector<8x128xf32>
    %296 = arith.minimumf %292, %295 : vector<8x128xf32>
    %297 = arith.minimumf %296, %285 : vector<8x128xf32>
    %298 = arith.subf %297, %292 : vector<8x128xf32>
    %299 = vector.broadcast %cst_50 : f32 to vector<8x128xf32>
    %300 = arith.mulf %298, %299 : vector<8x128xf32>
    %301 = math.exp %300 : vector<8x128xf32>
    %302 = arith.subf %297, %295 : vector<8x128xf32>
    %303 = vector.broadcast %cst_50 : f32 to vector<8x128xf32>
    %304 = arith.mulf %302, %303 : vector<8x128xf32>
    %305 = math.exp %304 : vector<8x128xf32>
    %306 = arith.addf %301, %305 : vector<8x128xf32>
    %307 = arith.subf %297, %285 : vector<8x128xf32>
    %308 = vector.broadcast %cst_50 : f32 to vector<8x128xf32>
    %309 = arith.mulf %307, %308 : vector<8x128xf32>
    %310 = math.exp %309 : vector<8x128xf32>
    %311 = arith.addf %306, %310 : vector<8x128xf32>
    %312 = math.log %311 : vector<8x128xf32>
    %313 = vector.broadcast %cst_51 : f32 to vector<8x128xf32>
    %314 = arith.mulf %313, %312 : vector<8x128xf32>
    %315 = arith.subf %297, %314 : vector<8x128xf32>
    %c1_i32_77 = arith.constant 1 : i32
    %316 = arith.subi %c5_i32, %c1_i32_77 : i32
    %c8_i32_78 = arith.constant 8 : i32
    %317 = arith.minsi %c8_i32_78, %316 : i32
    %318 = vector.broadcast %317 : i32 to vector<8x128xi32>
    %319 = arith.cmpi sle, %164, %318 : vector<8x128xi32>
    %320 = arith.andi %167, %319 : vector<8x128xi1>
    %321 = arith.addf %289, %315 : vector<8x128xf32>
    %322 = vector.broadcast %cst_49 : f32 to vector<8x128xf32>
    %323 = arith.select %320, %321, %322 : vector<8x128xi1>, vector<8x128xf32>
    %c6_i32 = arith.constant 6 : i32
    %c2_i32_79 = arith.constant 2 : i32
    %324 = arith.subi %c6_i32, %c2_i32_79 : i32
    %325 = arith.index_cast %324 : i32 to index
    %c0_80 = arith.constant 0 : index
    %c0_81 = arith.constant 0 : index
    %326 = vector.load %arg4[%325, %c0_80, %c0_81] : memref<15x8x128xf32, #tpu.memory_space<vmem>>, vector<1x8x128xf32>
    %327 = vector.shape_cast %326 : vector<1x8x128xf32> to vector<8x128xf32>
    %c1_i32_82 = arith.constant 1 : i32
    %328 = tpu.dynamic_rotate %285 by %c1_i32_82 dim 1 : vector<8x128xf32>, i32 -> vector<8x128xf32>
    %329 = vector.broadcast %cst_49 : f32 to vector<8x128xf32>
    %330 = arith.select %166, %329, %328 : vector<8x128xi1>, vector<8x128xf32>
    %c1_i32_83 = arith.constant 1 : i32
    %331 = tpu.dynamic_rotate %323 by %c1_i32_83 dim 1 : vector<8x128xf32>, i32 -> vector<8x128xf32>
    %332 = vector.broadcast %cst_49 : f32 to vector<8x128xf32>
    %333 = arith.select %166, %332, %331 : vector<8x128xi1>, vector<8x128xf32>
    %334 = arith.minimumf %330, %333 : vector<8x128xf32>
    %335 = arith.minimumf %334, %323 : vector<8x128xf32>
    %336 = arith.subf %335, %330 : vector<8x128xf32>
    %337 = vector.broadcast %cst_50 : f32 to vector<8x128xf32>
    %338 = arith.mulf %336, %337 : vector<8x128xf32>
    %339 = math.exp %338 : vector<8x128xf32>
    %340 = arith.subf %335, %333 : vector<8x128xf32>
    %341 = vector.broadcast %cst_50 : f32 to vector<8x128xf32>
    %342 = arith.mulf %340, %341 : vector<8x128xf32>
    %343 = math.exp %342 : vector<8x128xf32>
    %344 = arith.addf %339, %343 : vector<8x128xf32>
    %345 = arith.subf %335, %323 : vector<8x128xf32>
    %346 = vector.broadcast %cst_50 : f32 to vector<8x128xf32>
    %347 = arith.mulf %345, %346 : vector<8x128xf32>
    %348 = math.exp %347 : vector<8x128xf32>
    %349 = arith.addf %344, %348 : vector<8x128xf32>
    %350 = math.log %349 : vector<8x128xf32>
    %351 = vector.broadcast %cst_51 : f32 to vector<8x128xf32>
    %352 = arith.mulf %351, %350 : vector<8x128xf32>
    %353 = arith.subf %335, %352 : vector<8x128xf32>
    %c1_i32_84 = arith.constant 1 : i32
    %354 = arith.subi %c6_i32, %c1_i32_84 : i32
    %c8_i32_85 = arith.constant 8 : i32
    %355 = arith.minsi %c8_i32_85, %354 : i32
    %356 = vector.broadcast %355 : i32 to vector<8x128xi32>
    %357 = arith.cmpi sle, %164, %356 : vector<8x128xi32>
    %358 = arith.andi %167, %357 : vector<8x128xi1>
    %359 = arith.addf %327, %353 : vector<8x128xf32>
    %360 = vector.broadcast %cst_49 : f32 to vector<8x128xf32>
    %361 = arith.select %358, %359, %360 : vector<8x128xi1>, vector<8x128xf32>
    %c7_i32 = arith.constant 7 : i32
    %c2_i32_86 = arith.constant 2 : i32
    %362 = arith.subi %c7_i32, %c2_i32_86 : i32
    %363 = arith.index_cast %362 : i32 to index
    %c0_87 = arith.constant 0 : index
    %c0_88 = arith.constant 0 : index
    %364 = vector.load %arg4[%363, %c0_87, %c0_88] : memref<15x8x128xf32, #tpu.memory_space<vmem>>, vector<1x8x128xf32>
    %365 = vector.shape_cast %364 : vector<1x8x128xf32> to vector<8x128xf32>
    %c1_i32_89 = arith.constant 1 : i32
    %366 = tpu.dynamic_rotate %323 by %c1_i32_89 dim 1 : vector<8x128xf32>, i32 -> vector<8x128xf32>
    %367 = vector.broadcast %cst_49 : f32 to vector<8x128xf32>
    %368 = arith.select %166, %367, %366 : vector<8x128xi1>, vector<8x128xf32>
    %c1_i32_90 = arith.constant 1 : i32
    %369 = tpu.dynamic_rotate %361 by %c1_i32_90 dim 1 : vector<8x128xf32>, i32 -> vector<8x128xf32>
    %370 = vector.broadcast %cst_49 : f32 to vector<8x128xf32>
    %371 = arith.select %166, %370, %369 : vector<8x128xi1>, vector<8x128xf32>
    %372 = arith.minimumf %368, %371 : vector<8x128xf32>
    %373 = arith.minimumf %372, %361 : vector<8x128xf32>
    %374 = arith.subf %373, %368 : vector<8x128xf32>
    %375 = vector.broadcast %cst_50 : f32 to vector<8x128xf32>
    %376 = arith.mulf %374, %375 : vector<8x128xf32>
    %377 = math.exp %376 : vector<8x128xf32>
    %378 = arith.subf %373, %371 : vector<8x128xf32>
    %379 = vector.broadcast %cst_50 : f32 to vector<8x128xf32>
    %380 = arith.mulf %378, %379 : vector<8x128xf32>
    %381 = math.exp %380 : vector<8x128xf32>
    %382 = arith.addf %377, %381 : vector<8x128xf32>
    %383 = arith.subf %373, %361 : vector<8x128xf32>
    %384 = vector.broadcast %cst_50 : f32 to vector<8x128xf32>
    %385 = arith.mulf %383, %384 : vector<8x128xf32>
    %386 = math.exp %385 : vector<8x128xf32>
    %387 = arith.addf %382, %386 : vector<8x128xf32>
    %388 = math.log %387 : vector<8x128xf32>
    %389 = vector.broadcast %cst_51 : f32 to vector<8x128xf32>
    %390 = arith.mulf %389, %388 : vector<8x128xf32>
    %391 = arith.subf %373, %390 : vector<8x128xf32>
    %c1_i32_91 = arith.constant 1 : i32
    %392 = arith.subi %c7_i32, %c1_i32_91 : i32
    %c8_i32_92 = arith.constant 8 : i32
    %393 = arith.minsi %c8_i32_92, %392 : i32
    %394 = vector.broadcast %393 : i32 to vector<8x128xi32>
    %395 = arith.cmpi sle, %164, %394 : vector<8x128xi32>
    %396 = arith.andi %167, %395 : vector<8x128xi1>
    %397 = arith.addf %365, %391 : vector<8x128xf32>
    %398 = vector.broadcast %cst_49 : f32 to vector<8x128xf32>
    %399 = arith.select %396, %397, %398 : vector<8x128xi1>, vector<8x128xf32>
    %c8_i32_93 = arith.constant 8 : i32
    %c2_i32_94 = arith.constant 2 : i32
    %400 = arith.subi %c8_i32_93, %c2_i32_94 : i32
    %401 = arith.index_cast %400 : i32 to index
    %c0_95 = arith.constant 0 : index
    %c0_96 = arith.constant 0 : index
    %402 = vector.load %arg4[%401, %c0_95, %c0_96] : memref<15x8x128xf32, #tpu.memory_space<vmem>>, vector<1x8x128xf32>
    %403 = vector.shape_cast %402 : vector<1x8x128xf32> to vector<8x128xf32>
    %c1_i32_97 = arith.constant 1 : i32
    %404 = tpu.dynamic_rotate %361 by %c1_i32_97 dim 1 : vector<8x128xf32>, i32 -> vector<8x128xf32>
    %405 = vector.broadcast %cst_49 : f32 to vector<8x128xf32>
    %406 = arith.select %166, %405, %404 : vector<8x128xi1>, vector<8x128xf32>
    %c1_i32_98 = arith.constant 1 : i32
    %407 = tpu.dynamic_rotate %399 by %c1_i32_98 dim 1 : vector<8x128xf32>, i32 -> vector<8x128xf32>
    %408 = vector.broadcast %cst_49 : f32 to vector<8x128xf32>
    %409 = arith.select %166, %408, %407 : vector<8x128xi1>, vector<8x128xf32>
    %410 = arith.minimumf %406, %409 : vector<8x128xf32>
    %411 = arith.minimumf %410, %399 : vector<8x128xf32>
    %412 = arith.subf %411, %406 : vector<8x128xf32>
    %413 = vector.broadcast %cst_50 : f32 to vector<8x128xf32>
    %414 = arith.mulf %412, %413 : vector<8x128xf32>
    %415 = math.exp %414 : vector<8x128xf32>
    %416 = arith.subf %411, %409 : vector<8x128xf32>
    %417 = vector.broadcast %cst_50 : f32 to vector<8x128xf32>
    %418 = arith.mulf %416, %417 : vector<8x128xf32>
    %419 = math.exp %418 : vector<8x128xf32>
    %420 = arith.addf %415, %419 : vector<8x128xf32>
    %421 = arith.subf %411, %399 : vector<8x128xf32>
    %422 = vector.broadcast %cst_50 : f32 to vector<8x128xf32>
    %423 = arith.mulf %421, %422 : vector<8x128xf32>
    %424 = math.exp %423 : vector<8x128xf32>
    %425 = arith.addf %420, %424 : vector<8x128xf32>
    %426 = math.log %425 : vector<8x128xf32>
    %427 = vector.broadcast %cst_51 : f32 to vector<8x128xf32>
    %428 = arith.mulf %427, %426 : vector<8x128xf32>
    %429 = arith.subf %411, %428 : vector<8x128xf32>
    %c1_i32_99 = arith.constant 1 : i32
    %430 = arith.subi %c8_i32_93, %c1_i32_99 : i32
    %c8_i32_100 = arith.constant 8 : i32
    %431 = arith.minsi %c8_i32_100, %430 : i32
    %432 = vector.broadcast %431 : i32 to vector<8x128xi32>
    %433 = arith.cmpi sle, %164, %432 : vector<8x128xi32>
    %434 = arith.andi %167, %433 : vector<8x128xi1>
    %435 = arith.addf %403, %429 : vector<8x128xf32>
    %436 = vector.broadcast %cst_49 : f32 to vector<8x128xf32>
    %437 = arith.select %434, %435, %436 : vector<8x128xi1>, vector<8x128xf32>
    %c9_i32 = arith.constant 9 : i32
    %c2_i32_101 = arith.constant 2 : i32
    %438 = arith.subi %c9_i32, %c2_i32_101 : i32
    %439 = arith.index_cast %438 : i32 to index
    %c0_102 = arith.constant 0 : index
    %c0_103 = arith.constant 0 : index
    %440 = vector.load %arg4[%439, %c0_102, %c0_103] : memref<15x8x128xf32, #tpu.memory_space<vmem>>, vector<1x8x128xf32>
    %441 = vector.shape_cast %440 : vector<1x8x128xf32> to vector<8x128xf32>
    %c1_i32_104 = arith.constant 1 : i32
    %442 = tpu.dynamic_rotate %399 by %c1_i32_104 dim 1 : vector<8x128xf32>, i32 -> vector<8x128xf32>
    %443 = vector.broadcast %cst_49 : f32 to vector<8x128xf32>
    %444 = arith.select %166, %443, %442 : vector<8x128xi1>, vector<8x128xf32>
    %c1_i32_105 = arith.constant 1 : i32
    %445 = tpu.dynamic_rotate %437 by %c1_i32_105 dim 1 : vector<8x128xf32>, i32 -> vector<8x128xf32>
    %446 = vector.broadcast %cst_49 : f32 to vector<8x128xf32>
    %447 = arith.select %166, %446, %445 : vector<8x128xi1>, vector<8x128xf32>
    %448 = arith.minimumf %444, %447 : vector<8x128xf32>
    %449 = arith.minimumf %448, %437 : vector<8x128xf32>
    %450 = arith.subf %449, %444 : vector<8x128xf32>
    %451 = vector.broadcast %cst_50 : f32 to vector<8x128xf32>
    %452 = arith.mulf %450, %451 : vector<8x128xf32>
    %453 = math.exp %452 : vector<8x128xf32>
    %454 = arith.subf %449, %447 : vector<8x128xf32>
    %455 = vector.broadcast %cst_50 : f32 to vector<8x128xf32>
    %456 = arith.mulf %454, %455 : vector<8x128xf32>
    %457 = math.exp %456 : vector<8x128xf32>
    %458 = arith.addf %453, %457 : vector<8x128xf32>
    %459 = arith.subf %449, %437 : vector<8x128xf32>
    %460 = vector.broadcast %cst_50 : f32 to vector<8x128xf32>
    %461 = arith.mulf %459, %460 : vector<8x128xf32>
    %462 = math.exp %461 : vector<8x128xf32>
    %463 = arith.addf %458, %462 : vector<8x128xf32>
    %464 = math.log %463 : vector<8x128xf32>
    %465 = vector.broadcast %cst_51 : f32 to vector<8x128xf32>
    %466 = arith.mulf %465, %464 : vector<8x128xf32>
    %467 = arith.subf %449, %466 : vector<8x128xf32>
    %c1_i32_106 = arith.constant 1 : i32
    %468 = arith.subi %c9_i32, %c1_i32_106 : i32
    %c8_i32_107 = arith.constant 8 : i32
    %469 = arith.minsi %c8_i32_107, %468 : i32
    %470 = vector.broadcast %469 : i32 to vector<8x128xi32>
    %471 = arith.cmpi sle, %164, %470 : vector<8x128xi32>
    %472 = arith.andi %167, %471 : vector<8x128xi1>
    %473 = arith.addf %441, %467 : vector<8x128xf32>
    %474 = vector.broadcast %cst_49 : f32 to vector<8x128xf32>
    %475 = arith.select %472, %473, %474 : vector<8x128xi1>, vector<8x128xf32>
    %c10_i32 = arith.constant 10 : i32
    %c2_i32_108 = arith.constant 2 : i32
    %476 = arith.subi %c10_i32, %c2_i32_108 : i32
    %477 = arith.index_cast %476 : i32 to index
    %c0_109 = arith.constant 0 : index
    %c0_110 = arith.constant 0 : index
    %478 = vector.load %arg4[%477, %c0_109, %c0_110] : memref<15x8x128xf32, #tpu.memory_space<vmem>>, vector<1x8x128xf32>
    %479 = vector.shape_cast %478 : vector<1x8x128xf32> to vector<8x128xf32>
    %c1_i32_111 = arith.constant 1 : i32
    %480 = tpu.dynamic_rotate %437 by %c1_i32_111 dim 1 : vector<8x128xf32>, i32 -> vector<8x128xf32>
    %481 = vector.broadcast %cst_49 : f32 to vector<8x128xf32>
    %482 = arith.select %166, %481, %480 : vector<8x128xi1>, vector<8x128xf32>
    %c1_i32_112 = arith.constant 1 : i32
    %483 = tpu.dynamic_rotate %475 by %c1_i32_112 dim 1 : vector<8x128xf32>, i32 -> vector<8x128xf32>
    %484 = vector.broadcast %cst_49 : f32 to vector<8x128xf32>
    %485 = arith.select %166, %484, %483 : vector<8x128xi1>, vector<8x128xf32>
    %486 = arith.minimumf %482, %485 : vector<8x128xf32>
    %487 = arith.minimumf %486, %475 : vector<8x128xf32>
    %488 = arith.subf %487, %482 : vector<8x128xf32>
    %489 = vector.broadcast %cst_50 : f32 to vector<8x128xf32>
    %490 = arith.mulf %488, %489 : vector<8x128xf32>
    %491 = math.exp %490 : vector<8x128xf32>
    %492 = arith.subf %487, %485 : vector<8x128xf32>
    %493 = vector.broadcast %cst_50 : f32 to vector<8x128xf32>
    %494 = arith.mulf %492, %493 : vector<8x128xf32>
    %495 = math.exp %494 : vector<8x128xf32>
    %496 = arith.addf %491, %495 : vector<8x128xf32>
    %497 = arith.subf %487, %475 : vector<8x128xf32>
    %498 = vector.broadcast %cst_50 : f32 to vector<8x128xf32>
    %499 = arith.mulf %497, %498 : vector<8x128xf32>
    %500 = math.exp %499 : vector<8x128xf32>
    %501 = arith.addf %496, %500 : vector<8x128xf32>
    %502 = math.log %501 : vector<8x128xf32>
    %503 = vector.broadcast %cst_51 : f32 to vector<8x128xf32>
    %504 = arith.mulf %503, %502 : vector<8x128xf32>
    %505 = arith.subf %487, %504 : vector<8x128xf32>
    %c1_i32_113 = arith.constant 1 : i32
    %506 = arith.subi %c10_i32, %c1_i32_113 : i32
    %c8_i32_114 = arith.constant 8 : i32
    %507 = arith.minsi %c8_i32_114, %506 : i32
    %508 = vector.broadcast %507 : i32 to vector<8x128xi32>
    %509 = arith.cmpi sle, %164, %508 : vector<8x128xi32>
    %510 = arith.andi %167, %509 : vector<8x128xi1>
    %511 = arith.addf %479, %505 : vector<8x128xf32>
    %512 = vector.broadcast %cst_49 : f32 to vector<8x128xf32>
    %513 = arith.select %510, %511, %512 : vector<8x128xi1>, vector<8x128xf32>
    %c11_i32 = arith.constant 11 : i32
    %c2_i32_115 = arith.constant 2 : i32
    %514 = arith.subi %c11_i32, %c2_i32_115 : i32
    %515 = arith.index_cast %514 : i32 to index
    %c0_116 = arith.constant 0 : index
    %c0_117 = arith.constant 0 : index
    %516 = vector.load %arg4[%515, %c0_116, %c0_117] : memref<15x8x128xf32, #tpu.memory_space<vmem>>, vector<1x8x128xf32>
    %517 = vector.shape_cast %516 : vector<1x8x128xf32> to vector<8x128xf32>
    %c1_i32_118 = arith.constant 1 : i32
    %518 = tpu.dynamic_rotate %475 by %c1_i32_118 dim 1 : vector<8x128xf32>, i32 -> vector<8x128xf32>
    %519 = vector.broadcast %cst_49 : f32 to vector<8x128xf32>
    %520 = arith.select %166, %519, %518 : vector<8x128xi1>, vector<8x128xf32>
    %c1_i32_119 = arith.constant 1 : i32
    %521 = tpu.dynamic_rotate %513 by %c1_i32_119 dim 1 : vector<8x128xf32>, i32 -> vector<8x128xf32>
    %522 = vector.broadcast %cst_49 : f32 to vector<8x128xf32>
    %523 = arith.select %166, %522, %521 : vector<8x128xi1>, vector<8x128xf32>
    %524 = arith.minimumf %520, %523 : vector<8x128xf32>
    %525 = arith.minimumf %524, %513 : vector<8x128xf32>
    %526 = arith.subf %525, %520 : vector<8x128xf32>
    %527 = vector.broadcast %cst_50 : f32 to vector<8x128xf32>
    %528 = arith.mulf %526, %527 : vector<8x128xf32>
    %529 = math.exp %528 : vector<8x128xf32>
    %530 = arith.subf %525, %523 : vector<8x128xf32>
    %531 = vector.broadcast %cst_50 : f32 to vector<8x128xf32>
    %532 = arith.mulf %530, %531 : vector<8x128xf32>
    %533 = math.exp %532 : vector<8x128xf32>
    %534 = arith.addf %529, %533 : vector<8x128xf32>
    %535 = arith.subf %525, %513 : vector<8x128xf32>
    %536 = vector.broadcast %cst_50 : f32 to vector<8x128xf32>
    %537 = arith.mulf %535, %536 : vector<8x128xf32>
    %538 = math.exp %537 : vector<8x128xf32>
    %539 = arith.addf %534, %538 : vector<8x128xf32>
    %540 = math.log %539 : vector<8x128xf32>
    %541 = vector.broadcast %cst_51 : f32 to vector<8x128xf32>
    %542 = arith.mulf %541, %540 : vector<8x128xf32>
    %543 = arith.subf %525, %542 : vector<8x128xf32>
    %c1_i32_120 = arith.constant 1 : i32
    %544 = arith.subi %c11_i32, %c1_i32_120 : i32
    %c8_i32_121 = arith.constant 8 : i32
    %545 = arith.minsi %c8_i32_121, %544 : i32
    %546 = vector.broadcast %545 : i32 to vector<8x128xi32>
    %547 = arith.cmpi sle, %164, %546 : vector<8x128xi32>
    %548 = arith.andi %167, %547 : vector<8x128xi1>
    %549 = arith.addf %517, %543 : vector<8x128xf32>
    %550 = vector.broadcast %cst_49 : f32 to vector<8x128xf32>
    %551 = arith.select %548, %549, %550 : vector<8x128xi1>, vector<8x128xf32>
    %c12_i32 = arith.constant 12 : i32
    %c2_i32_122 = arith.constant 2 : i32
    %552 = arith.subi %c12_i32, %c2_i32_122 : i32
    %553 = arith.index_cast %552 : i32 to index
    %c0_123 = arith.constant 0 : index
    %c0_124 = arith.constant 0 : index
    %554 = vector.load %arg4[%553, %c0_123, %c0_124] : memref<15x8x128xf32, #tpu.memory_space<vmem>>, vector<1x8x128xf32>
    %555 = vector.shape_cast %554 : vector<1x8x128xf32> to vector<8x128xf32>
    %c1_i32_125 = arith.constant 1 : i32
    %556 = tpu.dynamic_rotate %513 by %c1_i32_125 dim 1 : vector<8x128xf32>, i32 -> vector<8x128xf32>
    %557 = vector.broadcast %cst_49 : f32 to vector<8x128xf32>
    %558 = arith.select %166, %557, %556 : vector<8x128xi1>, vector<8x128xf32>
    %c1_i32_126 = arith.constant 1 : i32
    %559 = tpu.dynamic_rotate %551 by %c1_i32_126 dim 1 : vector<8x128xf32>, i32 -> vector<8x128xf32>
    %560 = vector.broadcast %cst_49 : f32 to vector<8x128xf32>
    %561 = arith.select %166, %560, %559 : vector<8x128xi1>, vector<8x128xf32>
    %562 = arith.minimumf %558, %561 : vector<8x128xf32>
    %563 = arith.minimumf %562, %551 : vector<8x128xf32>
    %564 = arith.subf %563, %558 : vector<8x128xf32>
    %565 = vector.broadcast %cst_50 : f32 to vector<8x128xf32>
    %566 = arith.mulf %564, %565 : vector<8x128xf32>
    %567 = math.exp %566 : vector<8x128xf32>
    %568 = arith.subf %563, %561 : vector<8x128xf32>
    %569 = vector.broadcast %cst_50 : f32 to vector<8x128xf32>
    %570 = arith.mulf %568, %569 : vector<8x128xf32>
    %571 = math.exp %570 : vector<8x128xf32>
    %572 = arith.addf %567, %571 : vector<8x128xf32>
    %573 = arith.subf %563, %551 : vector<8x128xf32>
    %574 = vector.broadcast %cst_50 : f32 to vector<8x128xf32>
    %575 = arith.mulf %573, %574 : vector<8x128xf32>
    %576 = math.exp %575 : vector<8x128xf32>
    %577 = arith.addf %572, %576 : vector<8x128xf32>
    %578 = math.log %577 : vector<8x128xf32>
    %579 = vector.broadcast %cst_51 : f32 to vector<8x128xf32>
    %580 = arith.mulf %579, %578 : vector<8x128xf32>
    %581 = arith.subf %563, %580 : vector<8x128xf32>
    %c1_i32_127 = arith.constant 1 : i32
    %582 = arith.subi %c12_i32, %c1_i32_127 : i32
    %c8_i32_128 = arith.constant 8 : i32
    %583 = arith.minsi %c8_i32_128, %582 : i32
    %584 = vector.broadcast %583 : i32 to vector<8x128xi32>
    %585 = arith.cmpi sle, %164, %584 : vector<8x128xi32>
    %586 = arith.andi %167, %585 : vector<8x128xi1>
    %587 = arith.addf %555, %581 : vector<8x128xf32>
    %588 = vector.broadcast %cst_49 : f32 to vector<8x128xf32>
    %589 = arith.select %586, %587, %588 : vector<8x128xi1>, vector<8x128xf32>
    %c13_i32 = arith.constant 13 : i32
    %c2_i32_129 = arith.constant 2 : i32
    %590 = arith.subi %c13_i32, %c2_i32_129 : i32
    %591 = arith.index_cast %590 : i32 to index
    %c0_130 = arith.constant 0 : index
    %c0_131 = arith.constant 0 : index
    %592 = vector.load %arg4[%591, %c0_130, %c0_131] : memref<15x8x128xf32, #tpu.memory_space<vmem>>, vector<1x8x128xf32>
    %593 = vector.shape_cast %592 : vector<1x8x128xf32> to vector<8x128xf32>
    %c1_i32_132 = arith.constant 1 : i32
    %594 = tpu.dynamic_rotate %551 by %c1_i32_132 dim 1 : vector<8x128xf32>, i32 -> vector<8x128xf32>
    %595 = vector.broadcast %cst_49 : f32 to vector<8x128xf32>
    %596 = arith.select %166, %595, %594 : vector<8x128xi1>, vector<8x128xf32>
    %c1_i32_133 = arith.constant 1 : i32
    %597 = tpu.dynamic_rotate %589 by %c1_i32_133 dim 1 : vector<8x128xf32>, i32 -> vector<8x128xf32>
    %598 = vector.broadcast %cst_49 : f32 to vector<8x128xf32>
    %599 = arith.select %166, %598, %597 : vector<8x128xi1>, vector<8x128xf32>
    %600 = arith.minimumf %596, %599 : vector<8x128xf32>
    %601 = arith.minimumf %600, %589 : vector<8x128xf32>
    %602 = arith.subf %601, %596 : vector<8x128xf32>
    %603 = vector.broadcast %cst_50 : f32 to vector<8x128xf32>
    %604 = arith.mulf %602, %603 : vector<8x128xf32>
    %605 = math.exp %604 : vector<8x128xf32>
    %606 = arith.subf %601, %599 : vector<8x128xf32>
    %607 = vector.broadcast %cst_50 : f32 to vector<8x128xf32>
    %608 = arith.mulf %606, %607 : vector<8x128xf32>
    %609 = math.exp %608 : vector<8x128xf32>
    %610 = arith.addf %605, %609 : vector<8x128xf32>
    %611 = arith.subf %601, %589 : vector<8x128xf32>
    %612 = vector.broadcast %cst_50 : f32 to vector<8x128xf32>
    %613 = arith.mulf %611, %612 : vector<8x128xf32>
    %614 = math.exp %613 : vector<8x128xf32>
    %615 = arith.addf %610, %614 : vector<8x128xf32>
    %616 = math.log %615 : vector<8x128xf32>
    %617 = vector.broadcast %cst_51 : f32 to vector<8x128xf32>
    %618 = arith.mulf %617, %616 : vector<8x128xf32>
    %619 = arith.subf %601, %618 : vector<8x128xf32>
    %c1_i32_134 = arith.constant 1 : i32
    %620 = arith.subi %c13_i32, %c1_i32_134 : i32
    %c8_i32_135 = arith.constant 8 : i32
    %621 = arith.minsi %c8_i32_135, %620 : i32
    %622 = vector.broadcast %621 : i32 to vector<8x128xi32>
    %623 = arith.cmpi sle, %164, %622 : vector<8x128xi32>
    %624 = arith.andi %167, %623 : vector<8x128xi1>
    %625 = arith.addf %593, %619 : vector<8x128xf32>
    %626 = vector.broadcast %cst_49 : f32 to vector<8x128xf32>
    %627 = arith.select %624, %625, %626 : vector<8x128xi1>, vector<8x128xf32>
    %c14_i32 = arith.constant 14 : i32
    %c2_i32_136 = arith.constant 2 : i32
    %628 = arith.subi %c14_i32, %c2_i32_136 : i32
    %629 = arith.index_cast %628 : i32 to index
    %c0_137 = arith.constant 0 : index
    %c0_138 = arith.constant 0 : index
    %630 = vector.load %arg4[%629, %c0_137, %c0_138] : memref<15x8x128xf32, #tpu.memory_space<vmem>>, vector<1x8x128xf32>
    %631 = vector.shape_cast %630 : vector<1x8x128xf32> to vector<8x128xf32>
    %c1_i32_139 = arith.constant 1 : i32
    %632 = tpu.dynamic_rotate %589 by %c1_i32_139 dim 1 : vector<8x128xf32>, i32 -> vector<8x128xf32>
    %633 = vector.broadcast %cst_49 : f32 to vector<8x128xf32>
    %634 = arith.select %166, %633, %632 : vector<8x128xi1>, vector<8x128xf32>
    %c1_i32_140 = arith.constant 1 : i32
    %635 = tpu.dynamic_rotate %627 by %c1_i32_140 dim 1 : vector<8x128xf32>, i32 -> vector<8x128xf32>
    %636 = vector.broadcast %cst_49 : f32 to vector<8x128xf32>
    %637 = arith.select %166, %636, %635 : vector<8x128xi1>, vector<8x128xf32>
    %638 = arith.minimumf %634, %637 : vector<8x128xf32>
    %639 = arith.minimumf %638, %627 : vector<8x128xf32>
    %640 = arith.subf %639, %634 : vector<8x128xf32>
    %641 = vector.broadcast %cst_50 : f32 to vector<8x128xf32>
    %642 = arith.mulf %640, %641 : vector<8x128xf32>
    %643 = math.exp %642 : vector<8x128xf32>
    %644 = arith.subf %639, %637 : vector<8x128xf32>
    %645 = vector.broadcast %cst_50 : f32 to vector<8x128xf32>
    %646 = arith.mulf %644, %645 : vector<8x128xf32>
    %647 = math.exp %646 : vector<8x128xf32>
    %648 = arith.addf %643, %647 : vector<8x128xf32>
    %649 = arith.subf %639, %627 : vector<8x128xf32>
    %650 = vector.broadcast %cst_50 : f32 to vector<8x128xf32>
    %651 = arith.mulf %649, %650 : vector<8x128xf32>
    %652 = math.exp %651 : vector<8x128xf32>
    %653 = arith.addf %648, %652 : vector<8x128xf32>
    %654 = math.log %653 : vector<8x128xf32>
    %655 = vector.broadcast %cst_51 : f32 to vector<8x128xf32>
    %656 = arith.mulf %655, %654 : vector<8x128xf32>
    %657 = arith.subf %639, %656 : vector<8x128xf32>
    %c1_i32_141 = arith.constant 1 : i32
    %658 = arith.subi %c14_i32, %c1_i32_141 : i32
    %c8_i32_142 = arith.constant 8 : i32
    %659 = arith.minsi %c8_i32_142, %658 : i32
    %660 = vector.broadcast %659 : i32 to vector<8x128xi32>
    %661 = arith.cmpi sle, %164, %660 : vector<8x128xi32>
    %662 = arith.andi %167, %661 : vector<8x128xi1>
    %663 = arith.addf %631, %657 : vector<8x128xf32>
    %664 = vector.broadcast %cst_49 : f32 to vector<8x128xf32>
    %665 = arith.select %662, %663, %664 : vector<8x128xi1>, vector<8x128xf32>
    %c15_i32 = arith.constant 15 : i32
    %c2_i32_143 = arith.constant 2 : i32
    %666 = arith.subi %c15_i32, %c2_i32_143 : i32
    %667 = arith.index_cast %666 : i32 to index
    %c0_144 = arith.constant 0 : index
    %c0_145 = arith.constant 0 : index
    %668 = vector.load %arg4[%667, %c0_144, %c0_145] : memref<15x8x128xf32, #tpu.memory_space<vmem>>, vector<1x8x128xf32>
    %669 = vector.shape_cast %668 : vector<1x8x128xf32> to vector<8x128xf32>
    %c1_i32_146 = arith.constant 1 : i32
    %670 = tpu.dynamic_rotate %627 by %c1_i32_146 dim 1 : vector<8x128xf32>, i32 -> vector<8x128xf32>
    %671 = vector.broadcast %cst_49 : f32 to vector<8x128xf32>
    %672 = arith.select %166, %671, %670 : vector<8x128xi1>, vector<8x128xf32>
    %c1_i32_147 = arith.constant 1 : i32
    %673 = tpu.dynamic_rotate %665 by %c1_i32_147 dim 1 : vector<8x128xf32>, i32 -> vector<8x128xf32>
    %674 = vector.broadcast %cst_49 : f32 to vector<8x128xf32>
    %675 = arith.select %166, %674, %673 : vector<8x128xi1>, vector<8x128xf32>
    %676 = arith.minimumf %672, %675 : vector<8x128xf32>
    %677 = arith.minimumf %676, %665 : vector<8x128xf32>
    %678 = arith.subf %677, %672 : vector<8x128xf32>
    %679 = vector.broadcast %cst_50 : f32 to vector<8x128xf32>
    %680 = arith.mulf %678, %679 : vector<8x128xf32>
    %681 = math.exp %680 : vector<8x128xf32>
    %682 = arith.subf %677, %675 : vector<8x128xf32>
    %683 = vector.broadcast %cst_50 : f32 to vector<8x128xf32>
    %684 = arith.mulf %682, %683 : vector<8x128xf32>
    %685 = math.exp %684 : vector<8x128xf32>
    %686 = arith.addf %681, %685 : vector<8x128xf32>
    %687 = arith.subf %677, %665 : vector<8x128xf32>
    %688 = vector.broadcast %cst_50 : f32 to vector<8x128xf32>
    %689 = arith.mulf %687, %688 : vector<8x128xf32>
    %690 = math.exp %689 : vector<8x128xf32>
    %691 = arith.addf %686, %690 : vector<8x128xf32>
    %692 = math.log %691 : vector<8x128xf32>
    %693 = vector.broadcast %cst_51 : f32 to vector<8x128xf32>
    %694 = arith.mulf %693, %692 : vector<8x128xf32>
    %695 = arith.subf %677, %694 : vector<8x128xf32>
    %c1_i32_148 = arith.constant 1 : i32
    %696 = arith.subi %c15_i32, %c1_i32_148 : i32
    %c8_i32_149 = arith.constant 8 : i32
    %697 = arith.minsi %c8_i32_149, %696 : i32
    %698 = vector.broadcast %697 : i32 to vector<8x128xi32>
    %699 = arith.cmpi sle, %164, %698 : vector<8x128xi32>
    %700 = arith.andi %167, %699 : vector<8x128xi1>
    %701 = arith.addf %669, %695 : vector<8x128xf32>
    %702 = vector.broadcast %cst_49 : f32 to vector<8x128xf32>
    %703 = arith.select %700, %701, %702 : vector<8x128xi1>, vector<8x128xf32>
    %c16_i32 = arith.constant 16 : i32
    %c2_i32_150 = arith.constant 2 : i32
    %704 = arith.subi %c16_i32, %c2_i32_150 : i32
    %705 = arith.index_cast %704 : i32 to index
    %c0_151 = arith.constant 0 : index
    %c0_152 = arith.constant 0 : index
    %706 = vector.load %arg4[%705, %c0_151, %c0_152] : memref<15x8x128xf32, #tpu.memory_space<vmem>>, vector<1x8x128xf32>
    %707 = vector.shape_cast %706 : vector<1x8x128xf32> to vector<8x128xf32>
    %c1_i32_153 = arith.constant 1 : i32
    %708 = tpu.dynamic_rotate %665 by %c1_i32_153 dim 1 : vector<8x128xf32>, i32 -> vector<8x128xf32>
    %709 = vector.broadcast %cst_49 : f32 to vector<8x128xf32>
    %710 = arith.select %166, %709, %708 : vector<8x128xi1>, vector<8x128xf32>
    %c1_i32_154 = arith.constant 1 : i32
    %711 = tpu.dynamic_rotate %703 by %c1_i32_154 dim 1 : vector<8x128xf32>, i32 -> vector<8x128xf32>
    %712 = vector.broadcast %cst_49 : f32 to vector<8x128xf32>
    %713 = arith.select %166, %712, %711 : vector<8x128xi1>, vector<8x128xf32>
    %714 = arith.minimumf %710, %713 : vector<8x128xf32>
    %715 = arith.minimumf %714, %703 : vector<8x128xf32>
    %716 = arith.subf %715, %710 : vector<8x128xf32>
    %717 = vector.broadcast %cst_50 : f32 to vector<8x128xf32>
    %718 = arith.mulf %716, %717 : vector<8x128xf32>
    %719 = math.exp %718 : vector<8x128xf32>
    %720 = arith.subf %715, %713 : vector<8x128xf32>
    %721 = vector.broadcast %cst_50 : f32 to vector<8x128xf32>
    %722 = arith.mulf %720, %721 : vector<8x128xf32>
    %723 = math.exp %722 : vector<8x128xf32>
    %724 = arith.addf %719, %723 : vector<8x128xf32>
    %725 = arith.subf %715, %703 : vector<8x128xf32>
    %726 = vector.broadcast %cst_50 : f32 to vector<8x128xf32>
    %727 = arith.mulf %725, %726 : vector<8x128xf32>
    %728 = math.exp %727 : vector<8x128xf32>
    %729 = arith.addf %724, %728 : vector<8x128xf32>
    %730 = math.log %729 : vector<8x128xf32>
    %731 = vector.broadcast %cst_51 : f32 to vector<8x128xf32>
    %732 = arith.mulf %731, %730 : vector<8x128xf32>
    %733 = arith.subf %715, %732 : vector<8x128xf32>
    %c1_i32_155 = arith.constant 1 : i32
    %734 = arith.subi %c16_i32, %c1_i32_155 : i32
    %c8_i32_156 = arith.constant 8 : i32
    %735 = arith.minsi %c8_i32_156, %734 : i32
    %736 = vector.broadcast %735 : i32 to vector<8x128xi32>
    %737 = arith.cmpi sle, %164, %736 : vector<8x128xi32>
    %738 = arith.andi %167, %737 : vector<8x128xi1>
    %739 = arith.addf %707, %733 : vector<8x128xf32>
    %740 = vector.broadcast %cst_49 : f32 to vector<8x128xf32>
    %741 = arith.select %738, %739, %740 : vector<8x128xi1>, vector<8x128xf32>
    %c15_i32_157 = arith.constant 15 : i32
    %c0_158 = arith.constant 0 : index
    %c0_159 = arith.constant 0 : index
    %742 = vector.load %arg3[%c0_158, %c0_159] : memref<8x128xf32, #tpu.memory_space<vmem>>, vector<8x128xf32>
    tpu.vector_store %arg3[%c0_158, %c0_159], %741 {strides = array<i32>} : memref<8x128xf32, #tpu.memory_space<vmem>>, vector<8x128xf32>,
    return
  }
  func.func @transform_0(%arg0: i32) -> (i32, i32, i32) {
    %c0_i32 = arith.constant 0 : i32
    %c0_i32_0 = arith.constant 0 : i32
    %c0_i32_1 = arith.constant 0 : i32
    return %arg0, %c0_i32, %c0_i32_0 : i32, i32, i32
  }
  func.func @transform_1(%arg0: i32) -> (i32, i32, i32) {
    %c0_i32 = arith.constant 0 : i32
    %c0_i32_0 = arith.constant 0 : i32
    %c0_i32_1 = arith.constant 0 : i32
    return %arg0, %c0_i32, %c0_i32_0 : i32, i32, i32
  }
  func.func @transform_2(%arg0: i32) -> (i32, i32) {
    %c0_i32 = arith.constant 0 : i32
    %c0_i32_0 = arith.constant 0 : i32
    return %arg0, %c0_i32 : i32, i32
  }
}

</mosaic_0001>

<bundles_post_ra>
// kernel: dtw_loss.1
= control target key start
LH: loop header
LB: loop body
LE: loop exit
PB: predicated region body
PF: predicated region fallthrough
CT: control target
= control target key end

     0   :  { %v1771_v0 = vmov 0   ;;  %v1772_v4 = vmov 1   ;;  %v1773_v11 = vmov 2   ;;  %v1774_v18 = vmov 3   ;;  %s1777_s12 = smov 1   ;;  %s2368_s1 = inlined_call_operand.vmem [shape: f32[8,8,4], index: 1, kind: input, shape index: {}]   ;;  %s2369_s0 = inlined_call_operand.vmem [shape: f32[8,8,4], index: 0, kind: input, shape index: {}]   ;;  %s2370_s2 = inlined_call_operand.vmem [shape: f32[8,128], index: 2, kind: output, shape index: {}]  }
   0x1   :  { %1623 = vset.pattern.permute.xlu1 %v1771_v0  ;;  %1622 = vset.pattern.permute.xlu0 %v1771_v0  ;;  %v1799_v1 = vld [vmem:[%s2368_s1 + $0x10] sm:$0xff]  ;;  %v1804_v2 = vld [vmem:[%s2368_s1 + $0x8] sm:$0xff]  ;;  %v1811_v3 = vld [vmem:[%s2368_s1] sm:$0xff]  ;;  %v99_v20 = vlaneseq  ;;  %vm724_vm0 = vcmask 64512   ;;  %vm789_vm2 = vcmask 1040384   ;;  %vm142_vm3 = vcmask 1046534  }
   0x2   :  { %82 = vperm.xlu1 %1623, %v1799_v1   ;;  %79 = vperm.xlu0 %1622, %v1804_v2   ;;  %v1819_v5 = vld [vmem:[%s2369_s0 + $0x10] sm:$0xff]  ;;  %v1824_v6 = vld [vmem:[%s2369_s0 + $0x8] sm:$0xff]  ;;  %v1831_v7 = vld [vmem:[%s2369_s0 + $0x18] sm:$0xff]  ;;  %vm144_vm4 = vcmask 1047559   ;;  %vm140_vm5 = vcmask 1045509   ;;  %vm138_vm6 = vcmask 1044484  }
   0x3   :  { %v1837_v8 = vld [vmem:[%s2368_s1 + $0x18] sm:$0xff]  ;;  %v1843_v9 = vld [vmem:[%s2369_s0 + $0x20] sm:$0xff]  ;;  %v1867_v12 = vld [vmem:[%s2368_s1 + $0x30] sm:$0xff]  ;;  %v1936_v21 = vand.u32 127, %v99_v20  ;;  %v102_v22 = vshrl.u32 %v99_v20, 7  ;;  %vm136_vm7 = vcmask 1043459  }
   0x4   :  { %v1856_v10 = vld [vmem:[%s2368_s1 + $0x20] sm:$0xff]  ;;  %v1875_v13 = vld [vmem:[%s2369_s0 + $0x28] sm:$0xff]  ;;  %v1882_v14 = vld [vmem:[%s2369_s0 + $0x30] sm:$0xff]  ;;  %vm134_vm8 = vcmask 1042434   ;;  %vm133_vm9 = vcmask 1041409   ;;  %vm1778_vm11 = vmmov 1  }
   0x5   :  { %v11_v15 = vld [vmem:[%s2369_s0] sm:$0xff]  ;;  %v1892_v16 = vld [vmem:[%s2369_s0 + $0x38] sm:$0xff]  ;;  %v1898_v17 = vld [vmem:[%s2368_s1 + $0x28] sm:$0xff]  ;;  %v1939_v25 = vsub.s32 %v1936_v21, %v102_v22  ;;  %vm1255_vm1 = vcmp.eq.s32.totalorder %v1936_v21, 0  ;;  %vm1281_vm10 = vcmp.le.s32.totalorder %v1936_v21, 1  ;;  %vm1305_vm14 = vcmp.le.s32.totalorder %v1936_v21, 2 }
   0x6   :  { %1624 = vset.pattern.permute.xlu1 %v1772_v4  ;;  %76 = vperm.xlu0 %1622, %v1811_v3   ;;  %v26_v19 = vld [vmem:[%s2368_s1 + $0x38] sm:$0xff]  ;;  %s1775_s1 = smov 257   ;;  %vm2260_vm12 = vmxor %vm1255_vm1, %vm1778_vm11  ;;  %vm1449_vm11 = vcmp.le.s32.totalorder %v1936_v21, 8 }
   0x7   :  { %259 = vperm.xlu1 %1624, %v1799_v1   ;;  %vm1282_vm13 = vmand %vm2260_vm12, %vm1281_vm10 }
   0x8   :  { %vm1306_vm15 = vmand %vm2260_vm12, %vm1305_vm14 }
   0xa   :  { %39 = vperm.xlu0 %1622, %v1819_v5  }
   0xb   :  { %1625 = vset.pattern.permute.xlu1 %v1771_v0 }
   0xc   :  { %34 = vperm.xlu1 %1625, %v1824_v6  }
   0xe   :  { %44 = vperm.xlu0 %1622, %v1831_v7  }
  0x10   :  { %85 = vperm.xlu1 %1625, %v1837_v8  }
  0x12   :  { %49 = vperm.xlu0 %1622, %v1843_v9  }
  0x14   :  { %1626 = vset.pattern.permute.xlu1 %v1772_v4 }
  0x15   :  { %225 = vperm.xlu1 %1626, %v1824_v6  }
  0x16   :  { %1635 = vset.pattern.permute.xlu0 %v1772_v4 }
  0x17   :  { %256 = vperm.xlu0 %1635, %v1804_v2  }
  0x19   :  { %262 = vperm.xlu1 %1626, %v1837_v8  }
  0x1b   :  { %253 = vperm.xlu0 %1635, %v1811_v3  }
  0x1d   :  { %1627 = vset.pattern.permute.xlu1 %v1773_v11 }
  0x1e   :  { %424 = vperm.xlu1 %1627, %v1804_v2  }
  0x1f   :  { %265 = vperm.xlu0 %1635, %v1856_v10  }
  0x22   :  { %1628 = vset.pattern.permute.xlu1 %v1771_v0 }
  0x23   :  { %233 = vperm.xlu0 %1635, %v1831_v7   ;;  %88 = vperm.xlu1 %1628, %v1856_v10  }
  0x27   :  { %1629 = vset.pattern.permute.xlu1 %v1772_v4  ;;  %271 = vperm.xlu0 %1635, %v1867_v12  }
  0x28   :  { %229 = vperm.xlu1 %1629, %v1819_v5  }
  0x2b   :  { %241 = vperm.xlu0 %1635, %v1875_v13  }
  0x2c   :  { %1630 = vset.pattern.permute.xlu1 %v1773_v11 }
  0x2d   :  { %427 = vperm.xlu1 %1630, %v1799_v1  }
  0x2f   :  { %245 = vperm.xlu0 %1635, %v1882_v14  }
  0x31   :  { %1631 = vset.pattern.permute.xlu1 %v1771_v0 }
  0x32   :  { %29 = vperm.xlu1 %1631, %v11_v15  }
  0x33   :  { %249 = vperm.xlu0 %1635, %v1892_v16  }
  0x36   :  { %91 = vperm.xlu1 %1631, %v1898_v17  }
  0x37   :  { %1647 = vset.pattern.permute.xlu0 %v1773_v11 }
  0x38   :  { %421 = vperm.xlu0 %1647, %v1811_v3  }
  0x3a   :  { %1632 = vset.pattern.permute.xlu1 %v1772_v4 }
  0x3b   :  { %221 = vperm.xlu1 %1632, %v11_v15  }
  0x3c   :  { %401 = vperm.xlu0 %1647, %v1831_v7  }
  0x3f   :  { %268 = vperm.xlu1 %1632, %v1898_v17  }
  0x40   :  { %413 = vperm.xlu0 %1647, %v1882_v14  }
  0x43   :  { %1633 = vset.pattern.permute.xlu1 %v1773_v11 }
  0x44   :  { %393 = vperm.xlu1 %1633, %v1824_v6   ;;  %417 = vperm.xlu0 %1647, %v1892_v16  }
  0x48   :  { %430 = vperm.xlu1 %1633, %v1837_v8   ;;  %1650 = vset.pattern.permute.xlu0 %v1774_v18 }
  0x49   :  { %595 = vperm.xlu0 %1650, %v1799_v1  }
  0x4c   :  { %1634 = vset.pattern.permute.xlu1 %v1774_v18 }
  0x4d   :  { %592 = vperm.xlu1 %1634, %v1804_v2   ;;  %589 = vperm.xlu0 %1650, %v1811_v3  }
  0x51   :  { %1636 = vset.pattern.permute.xlu1 %v1771_v0  ;;  %565 = vperm.xlu0 %1650, %v1819_v5  }
  0x52   :  { %94 = vperm.xlu1 %1636, %v1867_v12  }
  0x55   :  { %557 = vperm.xlu0 %1650, %v11_v15  }
  0x56   :  { %1637 = vset.pattern.permute.xlu1 %v1772_v4 }
  0x57   :  { %237 = vperm.xlu1 %1637, %v1843_v9  }
  0x59   :  { %610 = vperm.xlu0 %1650, %v26_v19  }
  0x5b   :  { %1638 = vset.pattern.permute.xlu1 %v1773_v11 }
  0x5c   :  { %397 = vperm.xlu1 %1638, %v1819_v5  }
  0x60   :  { %433 = vperm.xlu1 %1638, %v1856_v10  }
  0x64   :  { %1639 = vset.pattern.permute.xlu1 %v1771_v0 }
  0x65   :  { %54 = vperm.xlu1 %1639, %v1875_v13  }
  0x69   :  { %97 = vperm.xlu1 %1639, %v26_v19  }
  0x6d   :  { %1640 = vset.pattern.permute.xlu1 %v1772_v4 }
  0x6e   :  { %274 = vperm.xlu1 %1640, %v26_v19  }
  0x72   :  { %1641 = vset.pattern.permute.xlu1 %v1773_v11 }
  0x73   :  { %389 = vperm.xlu1 %1641, %v11_v15  }
  0x77   :  { %436 = vperm.xlu1 %1641, %v1898_v17  }
  0x7b   :  { %1642 = vset.pattern.permute.xlu1 %v1774_v18 }
  0x7c   :  { %561 = vperm.xlu1 %1642, %v1824_v6  }
  0x80   :  { %598 = vperm.xlu1 %1642, %v1837_v8  }
  0x81   :  { %v83_v23 = vpop.permute.xlu1 %82  ;;  %v80_v24 = vpop.permute.xlu0 %79 }
  0x82   :  { %v112_v28 = vrot.slane %v83_v23, %v1939_v25  ;;  %v108_v29 = vrot.slane %v80_v24, %v1939_v25 }
  0x84   :  { %1643 = vset.pattern.permute.xlu1 %v1771_v0 }
  0x85   :  { %v77_v26 = vpop.permute.xlu0 %76  ;;  %59 = vperm.xlu1 %1643, %v1882_v14  }
  0x86   :  { %v1943_v27 = vpop.permute.xlu1 %259  ;;  %v104_v2 = vrot.slane %v77_v26, %v1939_v25 }
  0x89   :  { %v40_v30 = vpop.permute.xlu0 %39  ;;  %1644 = vset.pattern.permute.xlu1 %v1773_v11 }
  0x8a   :  { %v1948_v31 = vsub.f32 %v40_v30, %v112_v28  ;;  %405 = vperm.xlu1 %1644, %v1843_v9  }
  0x8b   :  { %v35_v32 = vpop.permute.xlu1 %34 }
  0x8c   :  { %v197_v33 = vsub.f32 %v35_v32, %v108_v29 }
  0x8d   :  { %v45_v34 = vpop.permute.xlu0 %44 }
  0x8e   :  { %439 = vperm.xlu1 %1644, %v1867_v12   ;;  %v205_v43 = vmul.f32 %v197_v33, %v197_v33 }
  0x8f   :  { %v86_v35 = vpop.permute.xlu1 %85 }
  0x90   :  { %v116_v45 = vrot.slane %v86_v35, %v1939_v25 }
  0x91   :  { %v1952_v36 = vpop.permute.xlu0 %49 }
  0x92   :  { %1645 = vset.pattern.permute.xlu1 %v1774_v18  ;;  %v199_v49 = vsub.f32 %v45_v34, %v116_v45  ;;  %v287_v34 = vrot.slane %v1943_v27, %v1939_v25 }
  0x93   :  { %601 = vperm.xlu1 %1645, %v1856_v10  }
  0x94   :  { %v226_v37 = vpop.permute.xlu1 %225  ;;  %v207_v54 = vmul.f32 %v199_v49, %v199_v49 }
  0x96   :  { %v257_v38 = vpop.permute.xlu0 %256 }
  0x97   :  { %v283_v39 = vrot.slane %v257_v38, %v1939_v25  ;;  %1646 = vset.pattern.permute.xlu1 %v1771_v0 }
  0x98   :  { %v263_v40 = vpop.permute.xlu1 %262  ;;  %64 = vperm.xlu1 %1646, %v1892_v16  }
  0x99   :  { %v365_v41 = vsub.f32 %v226_v37, %v283_v39  ;;  %v291_v50 = vrot.slane %v263_v40, %v1939_v25 }
  0x9a   :  { %v254_v42 = vpop.permute.xlu0 %253 }
  0x9b   :  { %v373_v44 = vmul.f32 %v365_v41, %v365_v41  ;;  %v279_v4 = vrot.slane %v254_v42, %v1939_v25 }
  0x9c   :  { %1648 = vset.pattern.permute.xlu1 %v1773_v11 }
  0x9d   :  { %v1961_v46 = vpop.permute.xlu1 %424  ;;  %409 = vperm.xlu1 %1648, %v1875_v13   ;;  %v1964_v47 = vadd.f32 %v373_v44, %v205_v43 }
  0x9e   :  { %v266_v48 = vpop.permute.xlu0 %265 }
  0x9f   :  { %v295_v33 = vrot.slane %v266_v48, %v1939_v25  ;;  %v206_v48 = vmul.f32 %v1948_v31, %v1948_v31 }
  0xa1   :  { %442 = vperm.xlu1 %1648, %v26_v19  }
  0xa2   :  { %v234_v51 = vpop.permute.xlu0 %233  ;;  %v89_v52 = vpop.permute.xlu1 %88 }
  0xa3   :  { %v367_v53 = vsub.f32 %v234_v51, %v291_v50 }
  0xa5   :  { %v375_v55 = vmul.f32 %v367_v53, %v367_v53  ;;  %1649 = vset.pattern.permute.xlu1 %v1774_v18 }
  0xa6   :  { %569 = vperm.xlu1 %1649, %v1831_v7   ;;  %v272_v56 = vpop.permute.xlu0 %271 }
  0xa7   :  { %v383_v57 = vadd.f32 %v375_v55, %v207_v54  ;;  %v230_v58 = vpop.permute.xlu1 %229  ;;  %v303_v60 = vrot.slane %v272_v56, %v1939_v25 }
  0xa8   :  { %v366_v37 = vsub.f32 %v230_v58, %v287_v34 }
  0xaa   :  { %604 = vperm.xlu1 %1649, %v1898_v17   ;;  %v242_v59 = vpop.permute.xlu0 %241  ;;  %v374_v44 = vmul.f32 %v366_v37, %v366_v37 }
  0xac   :  { %v428_v61 = vpop.permute.xlu1 %427 }
  0xad   :  { %v455_v45 = vrot.slane %v428_v61, %v1939_v25 }
  0xae   :  { %573 = vperm.xlu1 %1649, %v1843_v9   ;;  %v246_v62 = vpop.permute.xlu0 %245 }
  0xaf   :  { %v1972_v63 = vsub.f32 %v246_v62, %v303_v60 }
  0xb1   :  { %v30_v0 = vpop.permute.xlu1 %29 }
  0xb2   :  { %607 = vperm.xlu1 %1649, %v1867_v12   ;;  %v1975_v1 = vpop.permute.xlu0 %249  ;;  %v196_v6 = vsub.f32 %v30_v0, %v104_v2 }
  0xb4   :  { %v204_v10 = vmul.f32 %v196_v6, %v196_v6 }
  0xb5   :  { %v92_v3 = vpop.permute.xlu1 %91 }
  0xb6   :  { %577 = vperm.xlu1 %1649, %v1875_v13  }
  0xb7   :  { %v1980_v5 = vpop.permute.xlu0 %421 }
  0xba   :  { %581 = vperm.xlu1 %1649, %v1882_v14   ;;  %v222_v7 = vpop.permute.xlu1 %221 }
  0xbb   :  { %v364_v8 = vsub.f32 %v222_v7, %v279_v4  ;;  %v402_v9 = vpop.permute.xlu0 %401 }
  0xbd   :  { %v372_v11 = vmul.f32 %v364_v8, %v364_v8  ;;  %v451_v8 = vrot.slane %v1961_v46, %v1939_v25 }
  0xbe   :  { %585 = vperm.xlu1 %1649, %v1892_v16   ;;  %v269_v12 = vpop.permute.xlu1 %268  ;;  %v120_v16 = vrot.slane %v89_v52, %v1939_v25  ;;  %v382_v52 = vadd.f32 %v374_v44, %v206_v48 }
  0xbf   :  { %v1984_v15 = vadd.f32 %v372_v11, %v204_v10  ;;  %v299_v17 = vrot.slane %v269_v12, %v1939_v25  ;;  %v1987_v13 = vpop.permute.xlu0 %413 }
  0xc0   :  { %v200_v35 = vsub.f32 %v1952_v36, %v120_v16 }
  0xc1   :  { %v369_v18 = vsub.f32 %v242_v59, %v299_v17 }
  0xc2   :  { %v208_v42 = vmul.f32 %v200_v35, %v200_v35 }
  0xc3   :  { %v394_v19 = vpop.permute.xlu1 %393  ;;  %v1989_v20 = vpop.permute.xlu0 %417  ;;  %v377_v61 = vmul.f32 %v369_v18, %v369_v18 }
  0xc7   :  { %v431_v22 = vpop.permute.xlu1 %430 }
  0xc8   :  { %v459_v14 = vrot.slane %v431_v22, %v1939_v25  ;;  %v596_v24 = vpop.permute.xlu0 %595 }
  0xc9   :  { %v623_v38 = vrot.slane %v596_v24, %v1939_v25 }
  0xca   :  { %v535_v23 = vsub.f32 %v402_v9, %v459_v14  ;;  %v533_v9 = vsub.f32 %v394_v19, %v451_v8 }
  0xcc   :  { %v543_v26 = vmul.f32 %v535_v23, %v535_v23  ;;  %v593_v28 = vpop.permute.xlu1 %592  ;;  %v590_v32 = vpop.permute.xlu0 %589  ;;  %v541_v18 = vmul.f32 %v533_v9, %v533_v9 }
  0xcd   :  { %v615_v10 = vrot.slane %v590_v32, %v1939_v25  ;;  %v619_v22 = vrot.slane %v593_v28, %v1939_v25 }
  0xce   :  { %v1992_v29 = vadd.f32 %v543_v26, %v383_v57  ;;  %v124_v57 = vrot.slane %v92_v3, %v1939_v25  ;;  %v447_v3 = vrot.slane %v1980_v5, %v1939_v25  ;;  %v549_v26 = vadd.f32 %v541_v18, %v1964_v47 }
  0xcf   :  { %v378_v47 = vmul.f32 %v1972_v63, %v1972_v63 }
  0xd0   :  { %v566_v41 = vpop.permute.xlu0 %565 }
  0xd1   :  { %v1995_v30 = vpop.permute.xlu1 %94  ;;  %v702_v49 = vsub.f32 %v566_v41, %v623_v38 }
  0xd2   :  { %v128_v35 = vrot.slane %v1995_v30, %v1939_v25 }
  0xd3   :  { %v710_v53 = vmul.f32 %v702_v49, %v702_v49 }
  0xd4   :  { %v558_v17 = vpop.permute.xlu0 %557 }
  0xd5   :  { %v700_v23 = vsub.f32 %v558_v17, %v615_v10 }
  0xd6   :  { %v238_v39 = vpop.permute.xlu1 %237 }
  0xd7   :  { %v368_v40 = vsub.f32 %v238_v39, %v295_v33  ;;  %v708_v16 = vmul.f32 %v700_v23, %v700_v23 }
  0xd9   :  { %v376_v43 = vmul.f32 %v368_v40, %v368_v40 }
  0xdb   :  { %v384_v50 = vadd.f32 %v376_v43, %v208_v42  ;;  %v398_v51 = vpop.permute.xlu1 %397 }
  0xdc   :  { %v534_v27 = vsub.f32 %v398_v51, %v455_v45 }
  0xde   :  { %v542_v36 = vmul.f32 %v534_v27, %v534_v27 }
  0xdf   :  { %v434_v54 = vpop.permute.xlu1 %433 }
  0xe0   :  { %v550_v55 = vadd.f32 %v542_v36, %v382_v52  ;;  %v463_v39 = vrot.slane %v434_v54, %v1939_v25 }
  0xe2   :  { %v718_v56 = vadd.f32 %v710_v53, %v550_v55 }
  0xe4   :  { %v55_v58 = vpop.permute.xlu1 %54  ;;  %v727_v59 = vsel %vm724_vm0, %v718_v56, 0.0 }
  0xe5   :  { %v201_v60 = vsub.f32 %v55_v58, %v124_v57  ;;  %743 = vrot.lane.b32.xlu1 %v727_v59, %s1775_s1 }
  0xe7   :  { %v209_v62 = vmul.f32 %v201_v60, %v201_v60 }
  0xe8   :  { %v98_v31 = vpop.permute.xlu1 %97 }
  0xe9   :  { %v2008_v0 = vadd.f32 %v377_v61, %v209_v62  ;;  %v132_v49 = vrot.slane %v98_v31, %v1939_v25 }
  0xed   :  { %v275_v2 = vpop.permute.xlu1 %274 }
  0xee   :  { %v307_v4 = vrot.slane %v275_v2, %v1939_v25 }
  0xf0   :  { %v371_v6 = vsub.f32 %v1975_v1, %v307_v4 }
  0xf2   :  { %v390_v7 = vpop.permute.xlu1 %389  ;;  %v379_v27 = vmul.f32 %v371_v6, %v371_v6 }
  0xf3   :  { %v532_v11 = vsub.f32 %v390_v7, %v447_v3 }
  0xf5   :  { %v540_v14 = vmul.f32 %v532_v11, %v532_v11 }
  0xf6   :  { %v437_v12 = vpop.permute.xlu1 %436 }
  0xf7   :  { %v548_v5 = vadd.f32 %v540_v14, %v1984_v15  ;;  %v467_v62 = vrot.slane %v437_v12, %v1939_v25 }
  0xf9   :  { %v716_v34 = vadd.f32 %v708_v16, %v548_v5 }
  0xfb   :  { %v562_v24 = vpop.permute.xlu1 %561  ;;  %v725_v38 = vsel %vm724_vm0, %v716_v34, 0.0 }
  0xfc   :  { %v701_v1 = vsub.f32 %v562_v24, %v619_v22  ;;  %v611_v22 = vpop.permute.xlu0 %610 }
  0xfd   :  { %v643_v16 = vrot.slane %v611_v22, %v1939_v25 }
  0xfe   :  { %v709_v33 = vmul.f32 %v701_v1, %v701_v1 }
  0xff   :  { %v599_v46 = vpop.permute.xlu1 %598 }
 0x100   :  { %v717_v19 = vadd.f32 %v709_v33, %v549_v26  ;;  %v627_v55 = vrot.slane %v599_v46, %v1939_v25 }
 0x102   :  { %v726_v32 = vsel %vm724_vm0, %v717_v19, 0.0 }
 0x103   :  { %739 = vrot.lane.b32.xlu0 %v726_v32, %s1775_s1 }
 0x104   :  { %v60_v28 = vpop.permute.xlu1 %59 }
 0x105   :  { %v202_v37 = vsub.f32 %v60_v28, %v128_v35 }
 0x107   :  { %v210_v15 = vmul.f32 %v202_v37, %v202_v37  ;;  %735 = vrot.lane.b32.xlu0 %v725_v38, %s1775_s1 }
 0x109   :  { %v386_v40 = vadd.f32 %v378_v47, %v210_v15  ;;  %v406_v41 = vpop.permute.xlu1 %405 }
 0x10a   :  { %v536_v42 = vsub.f32 %v406_v41, %v463_v39 }
 0x10c   :  { %v544_v43 = vmul.f32 %v536_v42, %v536_v42 }
 0x10d   :  { %v440_v44 = vpop.permute.xlu1 %439 }
 0x10e   :  { %v552_v30 = vadd.f32 %v544_v43, %v384_v50  ;;  %v471_v2 = vrot.slane %v440_v44, %v1939_v25 }
 0x110   :  { %v538_v8 = vsub.f32 %v1987_v13, %v471_v2 }
 0x112   :  { %v602_v45 = vpop.permute.xlu1 %601  ;;  %v546_v18 = vmul.f32 %v538_v8, %v538_v8 }
 0x113   :  { %v631_v50 = vrot.slane %v602_v45, %v1939_v25 }
 0x114   :  { %v554_v46 = vadd.f32 %v546_v18, %v386_v40 }
 0x117   :  { %v65_v51 = vpop.permute.xlu1 %64 }
 0x118   :  { %v203_v48 = vsub.f32 %v65_v51, %v132_v49 }
 0x11a   :  { %v211_v52 = vmul.f32 %v203_v48, %v203_v48 }
 0x11c   :  { %v387_v36 = vadd.f32 %v379_v27, %v211_v52  ;;  %v410_v63 = vpop.permute.xlu1 %409 }
 0x11d   :  { %v537_v4 = vsub.f32 %v410_v63, %v467_v62 }
 0x11f   :  { %v545_v9 = vmul.f32 %v537_v4, %v537_v4 }
 0x120   :  { %v443_v53 = vpop.permute.xlu1 %442 }
 0x121   :  { %v553_v14 = vadd.f32 %v545_v9, %v2008_v0 }
 0x125   :  { %v570_v56 = vpop.permute.xlu1 %569 }
 0x126   :  { %v703_v54 = vsub.f32 %v570_v56, %v627_v55 }
 0x128   :  { %v711_v57 = vmul.f32 %v703_v54, %v703_v54 }
 0x129   :  { %v605_v58 = vpop.permute.xlu1 %604 }
 0x12a   :  { %v719_v59 = vadd.f32 %v711_v57, %v1992_v29  ;;  %v475_v29 = vrot.slane %v443_v53, %v1939_v25  ;;  %v635_v10 = vrot.slane %v605_v58, %v1939_v25 }
 0x12c   :  { %v728_v60 = vsel %vm724_vm0, %v719_v59, 0.0  ;;  %v539_v23 = vsub.f32 %v1989_v20, %v475_v29 }
 0x12d   :  { %747 = vrot.lane.b32.xlu1 %v728_v60, %s1775_s1  ;;  %v574_v61 = vpop.permute.xlu1 %573 }
 0x12e   :  { %v704_v31 = vsub.f32 %v574_v61, %v631_v50  ;;  %v547_v33 = vmul.f32 %v539_v23, %v539_v23 }
 0x130   :  { %v712_v6 = vmul.f32 %v704_v31, %v704_v31  ;;  %v555_v20 = vadd.f32 %v547_v33, %v387_v36 }
 0x131   :  { %v608_v3 = vpop.permute.xlu1 %607 }
 0x132   :  { %v720_v7 = vadd.f32 %v712_v6, %v552_v30  ;;  %v639_v24 = vrot.slane %v608_v3, %v1939_v25  ;;  %v1776_v25 = vmov 1e+30  }
 0x133   :  { %v1257_v47 = vsel %vm1255_vm1, 0.0, %v1776_v25 }
 0x134   :  { %v729_v11 = vsel %vm724_vm0, %v720_v7, 0.0 }
 0x135   :  { %751 = vrot.lane.b32.xlu0 %v729_v11, %s1775_s1  ;;  %v578_v17 = vpop.permute.xlu1 %577 }
 0x136   :  { %v705_v12 = vsub.f32 %v578_v17, %v635_v10 }
 0x138   :  { %v713_v13 = vmul.f32 %v705_v12, %v705_v12 }
 0x139   :  { %v582_v1 = vpop.permute.xlu1 %581 }
 0x13a   :  { %v721_v26 = vadd.f32 %v713_v13, %v553_v14  ;;  %v706_v5 = vsub.f32 %v582_v1, %v639_v24 }
 0x13c   :  { %v714_v19 = vmul.f32 %v706_v5, %v706_v5  ;;  %v730_v34 = vsel %vm724_vm0, %v721_v26, 0.0 }
 0x13d   :  { %755 = vrot.lane.b32.xlu1 %v730_v34, %s1775_s1  ;;  %v586_v32 = vpop.permute.xlu1 %585 }
 0x13e   :  { %v722_v35 = vadd.f32 %v714_v19, %v554_v46  ;;  %v707_v0 = vsub.f32 %v586_v32, %v643_v16 }
 0x140   :  { %v715_v28 = vmul.f32 %v707_v0, %v707_v0  ;;  %v731_v37 = vsel %vm724_vm0, %v722_v35, 0.0 }
 0x141   :  { %759 = vrot.lane.b32.xlu0 %v731_v37, %s1775_s1 }
 0x142   :  { %v723_v38 = vadd.f32 %v715_v28, %v555_v20 }
 0x144   :  { %v732_v15 = vsel %vm724_vm0, %v723_v38, 0.0  ;;  %vm1329_vm0 = vcmp.le.s32.totalorder %v1936_v21, 3 }
 0x145   :  { %763 = vrot.lane.b32.xlu1 %v732_v15, %s1775_s1  ;;  %1259 = vrot.lane.b32.xlu0 %v1257_v47, %s1777_s12 }
 0x149   :  { %1262 = vrot.lane.b32.xlu1 %v1776_v25, %s1777_s12 }
 0x157   :  { %v744_v39 = vpop.permute.xlu1 %743 }
 0x158   :  { %v775_v40 = vrot.slane %v744_v39, 7 }
 0x15a   :  { %v792_v41 = vsel %vm789_vm2, 0.0, %v775_v40  ;;  %v800_v42 = vsel %vm789_vm2, %v775_v40, 0.0 }
 0x172   :  { %870 = vxpose.xlu1.b32.start [1/2] (short) (narrow) %v792_v41, 16 }
 0x175   :  { %v740_v43 = vpop.permute.xlu0 %739 }
 0x176   :  { %v774_v44 = vrot.slane %v740_v43, 7  ;;  %871 = vxpose.xlu1.b32.end [2/2] (short) (narrow) %v800_v42, 16 }
 0x178   :  { %v791_v30 = vsel %vm789_vm2, 0.0, %v774_v44  ;;  %v799_v49 = vsel %vm789_vm2, %v774_v44, 0.0 }
 0x179   :  { %v736_v45 = vpop.permute.xlu0 %735  ;;  %838 = vxpose.xlu0.b32.start [1/2] (short) (narrow) %v791_v30, 16 }
 0x17a   :  { %v773_v51 = vrot.slane %v736_v45, 7 }
 0x17c   :  { %v790_v48 = vsel %vm789_vm2, 0.0, %v773_v51  ;;  %v798_v27 = vsel %vm789_vm2, %v773_v51, 0.0 }
 0x17d   :  { %839 = vxpose.xlu0.b32.end [2/2] (short) (narrow) %v799_v49, 16 }
 0x181   :  { %806 = vxpose.xlu0.b32.start [1/2] (short) (narrow) %v790_v48, 16 }
 0x185   :  { %807 = vxpose.xlu0.b32.end [2/2] (short) (narrow) %v798_v27, 16 }
 0x19f   :  { %v748_v52 = vpop.permute.xlu1 %747 }
 0x1a0   :  { %v776_v36 = vrot.slane %v748_v52, 7 }
 0x1a2   :  { %v793_v63 = vsel %vm789_vm2, 0.0, %v776_v36  ;;  %v801_v53 = vsel %vm789_vm2, %v776_v36, 0.0 }
 0x1a3   :  { %902 = vxpose.xlu0.b32.start [1/2] (short) (narrow) %v793_v63, 16 }
 0x1a7   :  { %v752_v55 = vpop.permute.xlu0 %751  ;;  %903 = vxpose.xlu0.b32.end [2/2] (short) (narrow) %v801_v53, 16 }
 0x1a8   :  { %v777_v56 = vrot.slane %v752_v55, 7 }
 0x1aa   :  { %v794_v54 = vsel %vm789_vm2, 0.0, %v777_v56  ;;  %v802_v57 = vsel %vm789_vm2, %v777_v56, 0.0 }
 0x1ab   :  { %934 = vxpose.xlu1.b32.start [1/2] (short) (narrow) %v794_v54, 16 }
 0x1af   :  { %935 = vxpose.xlu1.b32.end [2/2] (short) (narrow) %v802_v57, 16  ;;  %v756_v58 = vpop.permute.xlu1 %755 }
 0x1b0   :  { %v778_v59 = vrot.slane %v756_v58, 7 }
 0x1b2   :  { %v795_v50 = vsel %vm789_vm2, 0.0, %v778_v59  ;;  %v803_v62 = vsel %vm789_vm2, %v778_v59, 0.0 }
 0x1b3   :  { %v760_v60 = vpop.permute.xlu0 %759  ;;  %966 = vxpose.xlu0.b32.start [1/2] (short) (narrow) %v795_v50, 16 }
 0x1b4   :  { %v779_v61 = vrot.slane %v760_v60, 7 }
 0x1b6   :  { %v796_v31 = vsel %vm789_vm2, 0.0, %v779_v61  ;;  %v804_v6 = vsel %vm789_vm2, %v779_v61, 0.0 }
 0x1b7   :  { %998 = vxpose.xlu1.b32.start [1/2] (short) (narrow) %v796_v31, 16  ;;  %967 = vxpose.xlu0.b32.end [2/2] (short) (narrow) %v803_v62, 16  ;;  %v764_v2 = vpop.permute.xlu1 %763  ;;  %v1260_v8 = vpop.permute.xlu0 %1259 }
 0x1b8   :  { %v780_v4 = vrot.slane %v764_v2, 7  ;;  %v1261_v11 = vsel %vm1255_vm1, 1e+30, %v1260_v8 }
 0x1ba   :  { %v797_v3 = vsel %vm789_vm2, 0.0, %v780_v4  ;;  %v805_v7 = vsel %vm789_vm2, %v780_v4, 0.0  ;;  %vm1330_vm2 = vmand %vm2260_vm12, %vm1329_vm0 }
 0x1bb   :  { %999 = vxpose.xlu1.b32.end [2/2] (short) (narrow) %v804_v6, 16  ;;  %1030 = vxpose.xlu0.b32.start [1/2] (short) (narrow) %v797_v3, 16  ;;  %v1263_v9 = vpop.permute.xlu1 %1262 }
 0x1bc   :  { %v2077_v17 = vsel %vm1255_vm1, 1e+30, %v1263_v9 }
 0x1bd   :  { %v1265_v22 = vmin.f32 %v1261_v11, %v2077_v17 }
 0x1bf   :  { %1031 = vxpose.xlu0.b32.end [2/2] (short) (narrow) %v805_v7, 16  ;;  %v2095_v5 = vmin.f32 %v1265_v22, 1e+30 }
 0x1c1   :  { %v1267_v32 = vsub.f32 %v2095_v5, %v1261_v11  ;;  %v1270_v35 = vsub.f32 %v2095_v5, %v2077_v17  ;;  %v1612_v37 = vadd.f32 -1e+30, %v2095_v5 }
 0x1c3   :  { %v1268_v20 = vmul.f32 1.442695, %v1267_v32  ;;  %v1271_v28 = vmul.f32 1.442695, %v1270_v35  ;;  %v1275_v38 = vmul.f32 1.442695, %v1612_v37 }
 0x1c5   :  { %1651 = vpow2.f32 %v1268_v20 }
 0x1c6   :  { %1653 = vpow2.f32 %v1271_v28 }
 0x1c7   :  { %1655 = vpow2.f32 %v1275_v38 }
 0x1cf   :  { %v1652_v25 = vpop.eup %1651 }
 0x1d0   :  { %v1654_v47 = vpop.eup %1653 }
 0x1d1   :  { %v1273_v15 = vadd.f32 %v1654_v47, %v1652_v25  ;;  %v1656_v39 = vpop.eup %1655 }
 0x1d3   :  { %v1277_v41 = vadd.f32 %v1656_v39, %v1273_v15 }
 0x1d5   :  { %1657 = vlog2.f32 %v1277_v41 }
 0x1df   :  { %v1658_v58 = vpop.eup %1657 }
 0x1e0   :  { %v2163_v8 = vmul.f32 0.6931472, %v1658_v58 }
 0x1f2   :  { %v886_v10 = vpop.trf.xlu1 }
 0x1f3   :  { %v2082_v14 = vrot.slane %v886_v10, 6 }
 0x1f6   :  { %v887_v24 = vpop.trf.xlu1 }
 0x1f7   :  { %v2099_v46 = vrot.slane %v887_v24, 6 }
 0x1f9   :  { %v854_v29 = vpop.trf.xlu0 }
 0x1fa   :  { %v2079_v18 = vrot.slane %v854_v29, 7 }
 0x1fc   :  { %v1142_v9 = vsel %vm133_vm9, %v2082_v14, %v2079_v18 }
 0x1fd   :  { %v855_v12 = vpop.trf.xlu0 }
 0x1fe   :  { %v2087_v13 = vrot.slane %v855_v12, 7 }
 0x200   :  { %v1244_v29 = vsel %vm133_vm9, %v2099_v46, %v2087_v13 }
 0x201   :  { %v2084_v23 = vpop.trf.xlu0 }
 0x202   :  { %1151 = vst [vmem:[#allocation2 + $0x29] sm:$0x80] %v2084_v23  ;;  %v1120_v1 = vsel %vm142_vm3, %v2079_v18, %v2084_v23  ;;  %v1131_v26 = vsel %vm144_vm4, %v2079_v18, %v2084_v23  ;;  %v1109_v40 = vsel %vm140_vm5, %v2079_v18, %v2084_v23  ;;  %v1098_v48 = vsel %vm138_vm6, %v2079_v18, %v2084_v23 }
 0x203   :  { %1140 = vst [vmem:[#allocation2 + $0x22] sm:$0xc0] %v1131_v26  ;;  %v1121_v16 = vsel %vm144_vm4, %v2082_v14, %v1120_v1  ;;  %v1110_v44 = vsel %vm142_vm3, %v2082_v14, %v1109_v40  ;;  %v1099_v63 = vsel %vm140_vm5, %v2082_v14, %v1098_v48  ;;  %v1087_v59 = vsel %vm136_vm7, %v2079_v18, %v2084_v23 }
 0x204   :  { %1129 = vst [vmem:[#allocation2 + $0x1b] sm:$0xe0] %v1121_v16  ;;  %v1071_v62 = vsel %vm134_vm8, %v2079_v18, %v2084_v23  ;;  %v1088_v6 = vsel %vm138_vm6, %v2082_v14, %v1087_v59 }
 0x205   :  { %v823_v33 = vpop.trf.xlu0  ;;  %v1073_v12 = vsel %vm136_vm7, %v2082_v14, %v1071_v62 }
 0x206   :  { %1253 = vst [vmem:[#allocation2 + $0x69] sm:$0x80] %v823_v33  ;;  %v1222_v19 = vsel %vm142_vm3, %v2087_v13, %v823_v33  ;;  %v1233_v34 = vsel %vm144_vm4, %v2087_v13, %v823_v33  ;;  %v1211_v45 = vsel %vm140_vm5, %v2087_v13, %v823_v33  ;;  %v1200_v55 = vsel %vm138_vm6, %v2087_v13, %v823_v33 }
 0x207   :  { %1242 = vst [vmem:[#allocation2 + $0x62] sm:$0xc0] %v1233_v34  ;;  %v1223_v0 = vsel %vm144_vm4, %v2099_v46, %v1222_v19  ;;  %v1212_v27 = vsel %vm142_vm3, %v2099_v46, %v1211_v45  ;;  %v1201_v50 = vsel %vm140_vm5, %v2099_v46, %v1200_v55  ;;  %v1162_v31 = vsel %vm133_vm9, %v2087_v13, %v823_v33 }
 0x208   :  { %1231 = vst [vmem:[#allocation2 + $0x5b] sm:$0xe0] %v1223_v0  ;;  %v1178_v2 = vsel %vm134_vm8, %v2087_v13, %v823_v33  ;;  %v1189_v3 = vsel %vm136_vm7, %v2087_v13, %v823_v33  ;;  %v1164_v22 = vsel %vm134_vm8, %v2099_v46, %v1162_v31 }
 0x209   :  { %v1179_v23 = vsel %vm136_vm7, %v2099_v46, %v1178_v2  ;;  %v1190_v24 = vsel %vm138_vm6, %v2099_v46, %v1189_v3 }
 0x223   :  { %v918_v42 = vpop.trf.xlu0 }
 0x224   :  { %v2114_v43 = vrot.slane %v918_v42, 5 }
 0x226   :  { %v1111_v30 = vsel %vm144_vm4, %v2114_v43, %v1110_v44  ;;  %v1100_v56 = vsel %vm142_vm3, %v2114_v43, %v1099_v63  ;;  %v1089_v10 = vsel %vm140_vm5, %v2114_v43, %v1088_v6  ;;  %v1075_v13 = vsel %vm138_vm6, %v2114_v43, %v1073_v12 }
 0x227   :  { %1118 = vst [vmem:[#allocation2 + $0x14] sm:$0xf0] %v1111_v30  ;;  %v919_v49 = vpop.trf.xlu0  ;;  %v1132_v1 = vsel %vm133_vm9, %v2114_v43, %v2082_v14  ;;  %v1143_v16 = vsel %vm134_vm8, %v2114_v43, %v1142_v9 }
 0x228   :  { %v2122_v51 = vrot.slane %v919_v49, 5 }
 0x22a   :  { %v1213_v52 = vsel %vm144_vm4, %v2122_v51, %v1212_v27  ;;  %v1202_v61 = vsel %vm142_vm3, %v2122_v51, %v1201_v50  ;;  %v1166_v33 = vsel %vm136_vm7, %v2122_v51, %v1164_v22  ;;  %v1180_v19 = vsel %vm138_vm6, %v2122_v51, %v1179_v23 }
 0x22b   :  { %v950_v36 = vpop.trf.xlu1  ;;  %1220 = vst [vmem:[#allocation2 + $0x54] sm:$0xf0] %v1213_v52  ;;  %v1191_v34 = vsel %vm140_vm5, %v2122_v51, %v1190_v24  ;;  %v1234_v14 = vsel %vm133_vm9, %v2122_v51, %v2099_v46  ;;  %v1245_v0 = vsel %vm134_vm8, %v2122_v51, %v1244_v29 }
 0x22c   :  { %v2133_v53 = vrot.slane %v950_v36, 4 }
 0x22e   :  { %v1101_v54 = vsel %vm144_vm4, %v2133_v53, %v1100_v56  ;;  %v1090_v18 = vsel %vm142_vm3, %v2133_v53, %v1089_v10  ;;  %v1077_v37 = vsel %vm140_vm5, %v2133_v53, %v1075_v13  ;;  %v1122_v38 = vsel %vm133_vm9, %v2133_v53, %v2114_v43 }
 0x22f   :  { %1107 = vst [vmem:[#allocation2 + $0xd] sm:$0xf8] %v1101_v54  ;;  %v951_v57 = vpop.trf.xlu1  ;;  %v1133_v25 = vsel %vm134_vm8, %v2133_v53, %v1132_v1  ;;  %v1144_v46 = vsel %vm136_vm7, %v2133_v53, %v1143_v16 }
 0x230   :  { %v2146_v60 = vrot.slane %v951_v57, 4 }
 0x232   :  { %v1203_v4 = vsel %vm144_vm4, %v2146_v60, %v1202_v61  ;;  %v1192_v47 = vsel %vm142_vm3, %v2146_v60, %v1191_v34  ;;  %v1168_v15 = vsel %vm138_vm6, %v2146_v60, %v1166_v33  ;;  %v1181_v41 = vsel %vm140_vm5, %v2146_v60, %v1180_v19 }
 0x233   :  { %1209 = vst [vmem:[#allocation2 + $0x4d] sm:$0xf8] %v1203_v4  ;;  %v982_v7 = vpop.trf.xlu0  ;;  %v1224_v42 = vsel %vm133_vm9, %v2146_v60, %v2122_v51  ;;  %v1235_v43 = vsel %vm134_vm8, %v2146_v60, %v1234_v14  ;;  %v1246_v31 = vsel %vm136_vm7, %v2146_v60, %v1245_v0 }
 0x234   :  { %v1078_v11 = vrot.slane %v982_v7, 3 }
 0x236   :  { %v1091_v26 = vsel %vm144_vm4, %v1078_v11, %v1090_v18  ;;  %v1079_v39 = vsel %vm142_vm3, %v1078_v11, %v1077_v37  ;;  %v1112_v49 = vsel %vm133_vm9, %v1078_v11, %v2133_v53  ;;  %v1123_v48 = vsel %vm134_vm8, %v1078_v11, %v1122_v38 }
 0x237   :  { %1096 = vst [vmem:[#allocation2 + $0x6] sm:$0xfc] %v1091_v26  ;;  %v983_v32 = vpop.trf.xlu0  ;;  %v1014_v35 = vpop.trf.xlu1  ;;  %v1134_v27 = vsel %vm136_vm7, %v1078_v11, %v1133_v25  ;;  %v1145_v52 = vsel %vm138_vm6, %v1078_v11, %v1144_v46 }
 0x238   :  { %v1169_v20 = vrot.slane %v983_v32, 3  ;;  %v1080_v28 = vrot.slane %v1014_v35, 2  ;;  %v1280_v35 = vsub.f32 %v2095_v5, %v2163_v8 }
 0x23a   :  { %v1193_v40 = vsel %vm144_vm4, %v1169_v20, %v1192_v47  ;;  %v1081_v44 = vsel %vm144_vm4, %v1080_v28, %v1079_v39  ;;  %v1182_v51 = vsel %vm142_vm3, %v1169_v20, %v1181_v41  ;;  %v1102_v36 = vsel %vm133_vm9, %v1080_v28, %v1078_v11 }
 0x23b   :  { %1198 = vst [vmem:[#allocation2 + $0x46] sm:$0xfc] %v1193_v40  ;;  %v1046_v30 = vpop.trf.xlu0  ;;  %v1015_v45 = vpop.trf.xlu1  ;;  %1085 = vst [vmem:[#allocation2 - $0x1] sm:$0xfe] %v1081_v44  ;;  %v1113_v56 = vsel %vm134_vm8, %v1080_v28, %v1112_v49  ;;  %v1124_v54 = vsel %vm136_vm7, %v1080_v28, %v1123_v48  ;;  %v1135_v57 = vsel %vm138_vm6, %v1080_v28, %v1134_v27 }
 0x23c   :  { %v1082_v63 = vrot.slane %v1046_v30, 1  ;;  %v1171_v55 = vrot.slane %v1015_v45, 2  ;;  %v1146_v53 = vsel %vm140_vm5, %v1080_v28, %v1145_v52  ;;  %v1170_v3 = vsel %vm140_vm5, %v1169_v20, %v1168_v15 }
 0x23d   :  { %v1214_v7 = vsel %vm133_vm9, %v1169_v20, %v2146_v60  ;;  %v1225_v9 = vsel %vm134_vm8, %v1169_v20, %v1224_v42  ;;  %v1236_v29 = vsel %vm136_vm7, %v1169_v20, %v1235_v43  ;;  %v1247_v10 = vsel %vm138_vm6, %v1169_v20, %v1246_v31 }
 0x23e   :  { %1086 = vst [vmem:[#allocation2 + $0x7] sm:$0x1] %v1082_v63  ;;  %v1092_v58 = vsel %vm133_vm9, %v1082_v63, %v1080_v28  ;;  %v1103_v59 = vsel %vm134_vm8, %v1082_v63, %v1102_v36  ;;  %v1114_v50 = vsel %vm136_vm7, %v1082_v63, %v1113_v56  ;;  %v1125_v61 = vsel %vm138_vm6, %v1082_v63, %v1124_v54 }
 0x23f   :  { %v1047_v62 = vpop.trf.xlu0  ;;  %1097 = vst [vmem:[#allocation2 + $0xe] sm:$0x3] %v1092_v58  ;;  %1108 = vst [vmem:[#allocation2 + $0x15] sm:$0x7] %v1103_v59  ;;  %v1136_v2 = vsel %vm140_vm5, %v1082_v63, %v1135_v57  ;;  %v1147_v4 = vsel %vm142_vm3, %v1082_v63, %v1146_v53  ;;  %v1183_v6 = vsel %vm144_vm4, %v1171_v55, %v1182_v51 }
 0x240   :  { %1119 = vst [vmem:[#allocation2 + $0x1c] sm:$0xf] %v1114_v50  ;;  %1130 = vst [vmem:[#allocation2 + $0x23] sm:$0x1f] %v1125_v61  ;;  %v1172_v11 = vsel %vm142_vm3, %v1171_v55, %v1170_v3  ;;  %v1204_v12 = vsel %vm133_vm9, %v1171_v55, %v1169_v20  ;;  %v1173_v22 = vrot.slane %v1047_v62, 1  ;;  %v1215_v23 = vsel %vm134_vm8, %v1171_v55, %v1214_v7 }
 0x241   :  { %1141 = vst [vmem:[#allocation2 + $0x2a] sm:$0x3f] %v1136_v2  ;;  %1152 = vst [vmem:[#allocation2 + $0x31] sm:$0x7f] %v1147_v4  ;;  %v1226_v18 = vsel %vm136_vm7, %v1171_v55, %v1225_v9  ;;  %v1237_v60 = vsel %vm138_vm6, %v1171_v55, %v1236_v29  ;;  %v1248_v24 = vsel %vm140_vm5, %v1171_v55, %v1247_v10 }
 0x242   :  { %1187 = vst [vmem:[#allocation2 + $0x3f] sm:$0xfe] %v1183_v6  ;;  %v2265_v1 = vsel %vm144_vm4, %v1173_v22, %v1172_v11  ;;  %1188 = vst [vmem:[#allocation2 + $0x47] sm:$0x1] %v1173_v22  ;;  %v1194_v26 = vsel %vm133_vm9, %v1173_v22, %v1171_v55  ;;  %v1205_v16 = vsel %vm134_vm8, %v1173_v22, %v1204_v12  ;;  %vm1425_vm9 = vcmp.le.s32.totalorder %v1936_v21, 7 }
 0x243   :  { %v1216_v33 = vsel %vm136_vm7, %v1173_v22, %v1215_v23  ;;  %1199 = vst [vmem:[#allocation2 + $0x4e] sm:$0x3] %v1194_v26  ;;  %1210 = vst [vmem:[#allocation2 + $0x55] sm:$0x7] %v1205_v16  ;;  %v1227_v19 = vsel %vm138_vm6, %v1173_v22, %v1226_v18  ;;  %v1238_v34 = vsel %vm140_vm5, %v1173_v22, %v1237_v60  ;;  %vm1377_vm5 = vcmp.le.s32.totalorder %v1936_v21, 5 }
 0x244   :  { %1221 = vst [vmem:[#allocation2 + $0x5c] sm:$0xf] %v1216_v33  ;;  %v1249_v32 = vsel %vm142_vm3, %v1173_v22, %v1248_v24  ;;  %1232 = vst [vmem:[#allocation2 + $0x63] sm:$0x1f] %v1227_v19  ;;  %vm1353_vm3 = vcmp.le.s32.totalorder %v1936_v21, 4  ;;  %vm1401_vm7 = vcmp.le.s32.totalorder %v1936_v21, 6 }
 0x245   :  { %1243 = vst [vmem:[#allocation2 + $0x6a] sm:$0x3f] %v1238_v34  ;;  %1254 = vst [vmem:[#allocation2 + $0x71] sm:$0x7f] %v1249_v32  ;;  %v1258_v14 = vld [vmem:[#allocation2] sm:$0xff] }
 0x246   :  { %v1283_v0 = vadd.f32 %v1280_v35, %v1258_v14  ;;  %v1309_v3 = vld [vmem:[#allocation2 + $0x10] sm:$0xff]  ;;  %vm1354_vm4 = vmand %vm2260_vm12, %vm1353_vm3 }
 0x247   :  { %vm1378_vm6 = vmand %vm2260_vm12, %vm1377_vm5 }
 0x248   :  { %v1284_v20 = vsel %vm1282_vm13, %v1283_v0, 1e+30  ;;  %vm1402_vm8 = vmand %vm2260_vm12, %vm1401_vm7 }
 0x249   :  { %1286 = vrot.lane.b32.xlu1 %v1284_v20, %s1777_s12  ;;  %vm1426_vm10 = vmand %vm2260_vm12, %vm1425_vm9 }
 0x24a   :  { %vm2323_vm13 = vmand %vm2260_vm12, %vm1449_vm11 }
 0x2bb   :  { %v1287_v28 = vpop.permute.xlu1 %1286 }
 0x2bc   :  { %v1288_v37 = vsel %vm1255_vm1, 1e+30, %v1287_v28 }
 0x2bd   :  { %v1289_v38 = vmin.f32 %v2077_v17, %v1288_v37 }
 0x2bf   :  { %v1290_v5 = vmin.f32 %v1289_v38, %v1284_v20 }
 0x2c1   :  { %v1291_v8 = vsub.f32 %v1290_v5, %v2077_v17  ;;  %v1294_v25 = vsub.f32 %v1290_v5, %v1288_v37  ;;  %v1298_v47 = vsub.f32 %v1290_v5, %v1284_v20  ;;  %v1285_v17 = vld [vmem:[#allocation2 + $0x8] sm:$0xff]  ;;  %v1333_v20 = vld [vmem:[#allocation2 + $0x18] sm:$0xff] }
 0x2c3   :  { %v1292_v46 = vmul.f32 1.442695, %v1291_v8  ;;  %v1295_v15 = vmul.f32 1.442695, %v1294_v25  ;;  %v1299_v39 = vmul.f32 1.442695, %v1298_v47 }
 0x2c5   :  { %1659 = vpow2.f32 %v1292_v46 }
 0x2c6   :  { %1661 = vpow2.f32 %v1295_v15 }
 0x2c7   :  { %1663 = vpow2.f32 %v1299_v39 }
 0x2cf   :  { %v1660_v40 = vpop.eup %1659 }
 0x2d0   :  { %v1662_v41 = vpop.eup %1661 }
 0x2d1   :  { %v1297_v42 = vadd.f32 %v1662_v41, %v1660_v40  ;;  %v1664_v43 = vpop.eup %1663 }
 0x2d3   :  { %v1301_v44 = vadd.f32 %v1664_v43, %v1297_v42 }
 0x2d5   :  { %1665 = vlog2.f32 %v1301_v44 }
 0x2df   :  { %v1666_v30 = vpop.eup %1665 }
 0x2e0   :  { %v1303_v45 = vmul.f32 0.6931472, %v1666_v30 }
 0x2e2   :  { %v1304_v49 = vsub.f32 %v1290_v5, %v1303_v45 }
 0x2e4   :  { %v1307_v48 = vadd.f32 %v1304_v49, %v1285_v17 }
 0x2e6   :  { %v1308_v27 = vsel %vm1306_vm15, %v1307_v48, 1e+30 }
 0x2e7   :  { %1310 = vrot.lane.b32.xlu0 %v1308_v27, %s1777_s12 }
 0x359   :  { %v1311_v52 = vpop.permute.xlu0 %1310 }
 0x35a   :  { %v1312_v51 = vsel %vm1255_vm1, 1e+30, %v1311_v52 }
 0x35b   :  { %v1313_v36 = vmin.f32 %v1288_v37, %v1312_v51 }
 0x35d   :  { %v1314_v63 = vmin.f32 %v1313_v36, %v1308_v27 }
 0x35f   :  { %v1315_v55 = vsub.f32 %v1314_v63, %v1288_v37  ;;  %v1318_v56 = vsub.f32 %v1314_v63, %v1312_v51  ;;  %v1322_v54 = vsub.f32 %v1314_v63, %v1308_v27  ;;  %v1357_v27 = vld [vmem:[#allocation2 + $0x20] sm:$0xff] }
 0x361   :  { %v1316_v57 = vmul.f32 1.442695, %v1315_v55  ;;  %v1319_v53 = vmul.f32 1.442695, %v1318_v56  ;;  %v1323_v58 = vmul.f32 1.442695, %v1322_v54 }
 0x363   :  { %1667 = vpow2.f32 %v1316_v57 }
 0x364   :  { %1669 = vpow2.f32 %v1319_v53 }
 0x365   :  { %1671 = vpow2.f32 %v1323_v58 }
 0x36d   :  { %v1668_v59 = vpop.eup %1667 }
 0x36e   :  { %v1670_v50 = vpop.eup %1669 }
 0x36f   :  { %v1321_v61 = vadd.f32 %v1670_v50, %v1668_v59  ;;  %v1672_v62 = vpop.eup %1671 }
 0x371   :  { %v1325_v31 = vadd.f32 %v1672_v62, %v1321_v61 }
 0x373   :  { %1673 = vlog2.f32 %v1325_v31 }
 0x37d   :  { %v1674_v2 = vpop.eup %1673 }
 0x37e   :  { %v1327_v4 = vmul.f32 0.6931472, %v1674_v2 }
 0x380   :  { %v1328_v6 = vsub.f32 %v1314_v63, %v1327_v4 }
 0x382   :  { %v1331_v7 = vadd.f32 %v1328_v6, %v1309_v3 }
 0x384   :  { %v1332_v9 = vsel %vm1330_vm2, %v1331_v7, 1e+30 }
 0x385   :  { %1334 = vrot.lane.b32.xlu1 %v1332_v9, %s1777_s12 }
 0x3f7   :  { %v1335_v29 = vpop.permute.xlu1 %1334 }
 0x3f8   :  { %v1336_v10 = vsel %vm1255_vm1, 1e+30, %v1335_v29 }
 0x3f9   :  { %v1337_v11 = vmin.f32 %v1312_v51, %v1336_v10 }
 0x3fb   :  { %v1338_v12 = vmin.f32 %v1337_v11, %v1332_v9 }
 0x3fd   :  { %v1339_v22 = vsub.f32 %v1338_v12, %v1312_v51  ;;  %v1342_v23 = vsub.f32 %v1338_v12, %v1336_v10  ;;  %v1346_v18 = vsub.f32 %v1338_v12, %v1332_v9  ;;  %v1381_v9 = vld [vmem:[#allocation2 + $0x28] sm:$0xff] }
 0x3ff   :  { %v1340_v60 = vmul.f32 1.442695, %v1339_v22  ;;  %v1343_v24 = vmul.f32 1.442695, %v1342_v23  ;;  %v1347_v26 = vmul.f32 1.442695, %v1346_v18 }
 0x401   :  { %1675 = vpow2.f32 %v1340_v60 }
 0x402   :  { %1677 = vpow2.f32 %v1343_v24 }
 0x403   :  { %1679 = vpow2.f32 %v1347_v26 }
 0x40b   :  { %v1676_v16 = vpop.eup %1675 }
 0x40c   :  { %v1678_v33 = vpop.eup %1677 }
 0x40d   :  { %v1345_v19 = vadd.f32 %v1678_v33, %v1676_v16  ;;  %v1680_v34 = vpop.eup %1679 }
 0x40f   :  { %v1349_v32 = vadd.f32 %v1680_v34, %v1345_v19 }
 0x411   :  { %1681 = vlog2.f32 %v1349_v32 }
 0x41b   :  { %v1682_v35 = vpop.eup %1681 }
 0x41c   :  { %v1351_v14 = vmul.f32 0.6931472, %v1682_v35 }
 0x41e   :  { %v1352_v0 = vsub.f32 %v1338_v12, %v1351_v14 }
 0x420   :  { %v1355_v28 = vadd.f32 %v1352_v0, %v1333_v20 }
 0x422   :  { %v1356_v37 = vsel %vm1354_vm4, %v1355_v28, 1e+30 }
 0x423   :  { %1358 = vrot.lane.b32.xlu1 %v1356_v37, %s1777_s12 }
 0x495   :  { %v1359_v38 = vpop.permute.xlu1 %1358 }
 0x496   :  { %v1360_v5 = vsel %vm1255_vm1, 1e+30, %v1359_v38 }
 0x497   :  { %v1361_v8 = vmin.f32 %v1336_v10, %v1360_v5 }
 0x499   :  { %v1362_v25 = vmin.f32 %v1361_v8, %v1356_v37 }
 0x49b   :  { %v1363_v47 = vsub.f32 %v1362_v25, %v1336_v10  ;;  %v1366_v46 = vsub.f32 %v1362_v25, %v1360_v5  ;;  %v1370_v15 = vsub.f32 %v1362_v25, %v1356_v37  ;;  %v1405_v37 = vld [vmem:[#allocation2 + $0x30] sm:$0xff] }
 0x49d   :  { %v1364_v39 = vmul.f32 1.442695, %v1363_v47  ;;  %v1367_v40 = vmul.f32 1.442695, %v1366_v46  ;;  %v1371_v41 = vmul.f32 1.442695, %v1370_v15 }
 0x49f   :  { %1683 = vpow2.f32 %v1364_v39 }
 0x4a0   :  { %1685 = vpow2.f32 %v1367_v40 }
 0x4a1   :  { %1687 = vpow2.f32 %v1371_v41 }
 0x4a9   :  { %v1684_v42 = vpop.eup %1683 }
 0x4aa   :  { %v1686_v43 = vpop.eup %1685 }
 0x4ab   :  { %v1369_v44 = vadd.f32 %v1686_v43, %v1684_v42  ;;  %v1688_v30 = vpop.eup %1687 }
 0x4ad   :  { %v1373_v45 = vadd.f32 %v1688_v30, %v1369_v44 }
 0x4af   :  { %1689 = vlog2.f32 %v1373_v45 }
 0x4b9   :  { %v1690_v49 = vpop.eup %1689 }
 0x4ba   :  { %v1375_v17 = vmul.f32 0.6931472, %v1690_v49 }
 0x4bc   :  { %v1376_v48 = vsub.f32 %v1362_v25, %v1375_v17 }
 0x4be   :  { %v1379_v52 = vadd.f32 %v1376_v48, %v1357_v27 }
 0x4c0   :  { %v1380_v51 = vsel %vm1378_vm6, %v1379_v52, 1e+30 }
 0x4c1   :  { %1382 = vrot.lane.b32.xlu1 %v1380_v51, %s1777_s12 }
 0x533   :  { %v1383_v36 = vpop.permute.xlu1 %1382 }
 0x534   :  { %v1384_v63 = vsel %vm1255_vm1, 1e+30, %v1383_v36 }
 0x535   :  { %v1385_v55 = vmin.f32 %v1360_v5, %v1384_v63 }
 0x537   :  { %v1386_v56 = vmin.f32 %v1385_v55, %v1380_v51 }
 0x539   :  { %v1387_v54 = vsub.f32 %v1386_v56, %v1360_v5  ;;  %v1390_v57 = vsub.f32 %v1386_v56, %v1384_v63  ;;  %v1394_v53 = vsub.f32 %v1386_v56, %v1380_v51 }
 0x53b   :  { %v1388_v58 = vmul.f32 1.442695, %v1387_v54  ;;  %v1391_v59 = vmul.f32 1.442695, %v1390_v57  ;;  %v1395_v50 = vmul.f32 1.442695, %v1394_v53 }
 0x53d   :  { %1691 = vpow2.f32 %v1388_v58 }
 0x53e   :  { %1693 = vpow2.f32 %v1391_v59 }
 0x53f   :  { %1695 = vpow2.f32 %v1395_v50 }
 0x547   :  { %v1692_v61 = vpop.eup %1691 }
 0x548   :  { %v1694_v62 = vpop.eup %1693 }
 0x549   :  { %v1393_v31 = vadd.f32 %v1694_v62, %v1692_v61  ;;  %v1696_v2 = vpop.eup %1695 }
 0x54b   :  { %v1397_v4 = vadd.f32 %v1696_v2, %v1393_v31 }
 0x54d   :  { %1697 = vlog2.f32 %v1397_v4 }
 0x557   :  { %v1698_v6 = vpop.eup %1697 }
 0x558   :  { %v1399_v3 = vmul.f32 0.6931472, %v1698_v6 }
 0x55a   :  { %v1400_v7 = vsub.f32 %v1386_v56, %v1399_v3 }
 0x55c   :  { %v1403_v29 = vadd.f32 %v1400_v7, %v1381_v9  ;;  %v1453_v9 = vld [vmem:[#allocation2 + $0x40] sm:$0xff] }
 0x55e   :  { %v1404_v10 = vsel %vm1402_vm8, %v1403_v29, 1e+30 }
 0x55f   :  { %1406 = vrot.lane.b32.xlu1 %v1404_v10, %s1777_s12 }
 0x5d1   :  { %v1407_v11 = vpop.permute.xlu1 %1406 }
 0x5d2   :  { %v1408_v12 = vsel %vm1255_vm1, 1e+30, %v1407_v11 }
 0x5d3   :  { %v1409_v22 = vmin.f32 %v1384_v63, %v1408_v12 }
 0x5d5   :  { %v1410_v23 = vmin.f32 %v1409_v22, %v1404_v10 }
 0x5d7   :  { %v1411_v18 = vsub.f32 %v1410_v23, %v1384_v63  ;;  %v1414_v60 = vsub.f32 %v1410_v23, %v1408_v12  ;;  %v1418_v24 = vsub.f32 %v1410_v23, %v1404_v10 }
 0x5d9   :  { %v1412_v26 = vmul.f32 1.442695, %v1411_v18  ;;  %v1415_v16 = vmul.f32 1.442695, %v1414_v60  ;;  %v1419_v33 = vmul.f32 1.442695, %v1418_v24 }
 0x5db   :  { %1699 = vpow2.f32 %v1412_v26 }
 0x5dc   :  { %1701 = vpow2.f32 %v1415_v16 }
 0x5dd   :  { %1703 = vpow2.f32 %v1419_v33 }
 0x5e5   :  { %v1700_v19 = vpop.eup %1699 }
 0x5e6   :  { %v1702_v34 = vpop.eup %1701 }
 0x5e7   :  { %v1417_v32 = vadd.f32 %v1702_v34, %v1700_v19  ;;  %v1704_v35 = vpop.eup %1703 }
 0x5e9   :  { %v1421_v14 = vadd.f32 %v1704_v35, %v1417_v32 }
 0x5eb   :  { %1705 = vlog2.f32 %v1421_v14 }
 0x5f5   :  { %v1706_v0 = vpop.eup %1705 }
 0x5f6   :  { %v1423_v20 = vmul.f32 0.6931472, %v1706_v0 }
 0x5f8   :  { %v1424_v28 = vsub.f32 %v1410_v23, %v1423_v20 }
 0x5fa   :  { %v1427_v38 = vadd.f32 %v1424_v28, %v1405_v37  ;;  %v1475_v37 = vld [vmem:[#allocation2 + $0x48] sm:$0xff] }
 0x5fc   :  { %v1428_v5 = vsel %vm1426_vm10, %v1427_v38, 1e+30 }
 0x5fd   :  { %1430 = vrot.lane.b32.xlu0 %v1428_v5, %s1777_s12 }
 0x66f   :  { %v1431_v8 = vpop.permute.xlu0 %1430 }
 0x670   :  { %v1432_v25 = vsel %vm1255_vm1, 1e+30, %v1431_v8 }
 0x671   :  { %v1433_v47 = vmin.f32 %v1408_v12, %v1432_v25 }
 0x673   :  { %v1434_v46 = vmin.f32 %v1433_v47, %v1428_v5 }
 0x675   :  { %v1435_v15 = vsub.f32 %v1434_v46, %v1408_v12  ;;  %v1438_v39 = vsub.f32 %v1434_v46, %v1432_v25  ;;  %v1442_v40 = vsub.f32 %v1434_v46, %v1428_v5 }
 0x677   :  { %v1436_v41 = vmul.f32 1.442695, %v1435_v15  ;;  %v1439_v42 = vmul.f32 1.442695, %v1438_v39  ;;  %v1443_v43 = vmul.f32 1.442695, %v1442_v40 }
 0x679   :  { %1707 = vpow2.f32 %v1436_v41 }
 0x67a   :  { %1709 = vpow2.f32 %v1439_v42 }
 0x67b   :  { %1711 = vpow2.f32 %v1443_v43 }
 0x683   :  { %v1708_v44 = vpop.eup %1707 }
 0x684   :  { %v1710_v30 = vpop.eup %1709 }
 0x685   :  { %v1441_v45 = vadd.f32 %v1710_v30, %v1708_v44  ;;  %v1712_v49 = vpop.eup %1711 }
 0x687   :  { %v1445_v17 = vadd.f32 %v1712_v49, %v1441_v45 }
 0x689   :  { %1713 = vlog2.f32 %v1445_v17 }
 0x693   :  { %v1714_v48 = vpop.eup %1713 }
 0x694   :  { %v1447_v27 = vmul.f32 0.6931472, %v1714_v48 }
 0x696   :  { %v1448_v52 = vsub.f32 %v1434_v46, %v1447_v27 }
 0x698   :  { %v1451_v36 = vadd.f32 %v1448_v52, %v2265_v1 }
 0x69a   :  { %v1452_v63 = vsel %vm2323_vm13, %v1451_v36, 1e+30  ;;  %v1497_v36 = vld [vmem:[#allocation2 + $0x50] sm:$0xff] }
 0x69b   :  { %1454 = vrot.lane.b32.xlu1 %v1452_v63, %s1777_s12 }
 0x70d   :  { %v1455_v55 = vpop.permute.xlu1 %1454 }
 0x70e   :  { %v1456_v56 = vsel %vm1255_vm1, 1e+30, %v1455_v55 }
 0x70f   :  { %v1457_v54 = vmin.f32 %v1432_v25, %v1456_v56 }
 0x711   :  { %v1458_v57 = vmin.f32 %v1457_v54, %v1452_v63 }
 0x713   :  { %v1459_v53 = vsub.f32 %v1458_v57, %v1432_v25  ;;  %v1462_v58 = vsub.f32 %v1458_v57, %v1456_v56  ;;  %v1466_v13 = vsub.f32 %v1458_v57, %v1452_v63 }
 0x715   :  { %v1460_v59 = vmul.f32 1.442695, %v1459_v53  ;;  %v1463_v50 = vmul.f32 1.442695, %v1462_v58  ;;  %v1467_v61 = vmul.f32 1.442695, %v1466_v13 }
 0x717   :  { %1715 = vpow2.f32 %v1460_v59 }
 0x718   :  { %1717 = vpow2.f32 %v1463_v50 }
 0x719   :  { %1719 = vpow2.f32 %v1467_v61 }
 0x721   :  { %v1716_v1 = vpop.eup %1715 }
 0x722   :  { %v1718_v62 = vpop.eup %1717 }
 0x723   :  { %v1465_v31 = vadd.f32 %v1718_v62, %v1716_v1  ;;  %v1720_v2 = vpop.eup %1719 }
 0x725   :  { %v1469_v4 = vadd.f32 %v1720_v2, %v1465_v31 }
 0x727   :  { %1721 = vlog2.f32 %v1469_v4 }
 0x731   :  { %v1722_v6 = vpop.eup %1721 }
 0x732   :  { %v1471_v3 = vmul.f32 0.6931472, %v1722_v6 }
 0x734   :  { %v1472_v7 = vsub.f32 %v1458_v57, %v1471_v3 }
 0x736   :  { %v1473_v29 = vadd.f32 %v1472_v7, %v1453_v9 }
 0x738   :  { %v1474_v10 = vsel %vm2323_vm13, %v1473_v29, 1e+30  ;;  %v1519_v29 = vld [vmem:[#allocation2 + $0x58] sm:$0xff] }
 0x739   :  { %1476 = vrot.lane.b32.xlu0 %v1474_v10, %s1777_s12 }
 0x7ab   :  { %v1477_v11 = vpop.permute.xlu0 %1476 }
 0x7ac   :  { %v1478_v12 = vsel %vm1255_vm1, 1e+30, %v1477_v11 }
 0x7ad   :  { %v1479_v22 = vmin.f32 %v1456_v56, %v1478_v12 }
 0x7af   :  { %v1480_v23 = vmin.f32 %v1479_v22, %v1474_v10 }
 0x7b1   :  { %v1481_v18 = vsub.f32 %v1480_v23, %v1456_v56  ;;  %v1484_v60 = vsub.f32 %v1480_v23, %v1478_v12  ;;  %v1488_v24 = vsub.f32 %v1480_v23, %v1474_v10 }
 0x7b3   :  { %v1482_v26 = vmul.f32 1.442695, %v1481_v18  ;;  %v1485_v16 = vmul.f32 1.442695, %v1484_v60  ;;  %v1489_v33 = vmul.f32 1.442695, %v1488_v24 }
 0x7b5   :  { %1723 = vpow2.f32 %v1482_v26 }
 0x7b6   :  { %1725 = vpow2.f32 %v1485_v16 }
 0x7b7   :  { %1727 = vpow2.f32 %v1489_v33 }
 0x7bf   :  { %v1724_v19 = vpop.eup %1723 }
 0x7c0   :  { %v1726_v34 = vpop.eup %1725 }
 0x7c1   :  { %v1487_v32 = vadd.f32 %v1726_v34, %v1724_v19  ;;  %v1728_v35 = vpop.eup %1727 }
 0x7c3   :  { %v1491_v14 = vadd.f32 %v1728_v35, %v1487_v32 }
 0x7c5   :  { %1729 = vlog2.f32 %v1491_v14 }
 0x7cf   :  { %v1730_v0 = vpop.eup %1729 }
 0x7d0   :  { %v1493_v20 = vmul.f32 0.6931472, %v1730_v0 }
 0x7d2   :  { %v1494_v28 = vsub.f32 %v1480_v23, %v1493_v20 }
 0x7d4   :  { %v1495_v38 = vadd.f32 %v1494_v28, %v1475_v37 }
 0x7d6   :  { %v1496_v5 = vsel %vm2323_vm13, %v1495_v38, 1e+30  ;;  %v1541_v38 = vld [vmem:[#allocation2 + $0x60] sm:$0xff] }
 0x7d7   :  { %1498 = vrot.lane.b32.xlu1 %v1496_v5, %s1777_s12 }
 0x849   :  { %v1499_v8 = vpop.permute.xlu1 %1498 }
 0x84a   :  { %v1500_v25 = vsel %vm1255_vm1, 1e+30, %v1499_v8 }
 0x84b   :  { %v1501_v47 = vmin.f32 %v1478_v12, %v1500_v25 }
 0x84d   :  { %v1502_v46 = vmin.f32 %v1501_v47, %v1496_v5 }
 0x84f   :  { %v1503_v15 = vsub.f32 %v1502_v46, %v1478_v12  ;;  %v1506_v39 = vsub.f32 %v1502_v46, %v1500_v25  ;;  %v1510_v40 = vsub.f32 %v1502_v46, %v1496_v5 }
 0x851   :  { %v1504_v41 = vmul.f32 1.442695, %v1503_v15  ;;  %v1507_v42 = vmul.f32 1.442695, %v1506_v39  ;;  %v1511_v43 = vmul.f32 1.442695, %v1510_v40 }
 0x853   :  { %1731 = vpow2.f32 %v1504_v41 }
 0x854   :  { %1733 = vpow2.f32 %v1507_v42 }
 0x855   :  { %1735 = vpow2.f32 %v1511_v43 }
 0x85d   :  { %v1732_v44 = vpop.eup %1731 }
 0x85e   :  { %v1734_v30 = vpop.eup %1733 }
 0x85f   :  { %v1509_v45 = vadd.f32 %v1734_v30, %v1732_v44  ;;  %v1736_v49 = vpop.eup %1735 }
 0x861   :  { %v1513_v17 = vadd.f32 %v1736_v49, %v1509_v45 }
 0x863   :  { %1737 = vlog2.f32 %v1513_v17 }
 0x86d   :  { %v1738_v48 = vpop.eup %1737 }
 0x86e   :  { %v1515_v27 = vmul.f32 0.6931472, %v1738_v48 }
 0x870   :  { %v1516_v52 = vsub.f32 %v1502_v46, %v1515_v27 }
 0x872   :  { %v1517_v63 = vadd.f32 %v1516_v52, %v1497_v36 }
 0x874   :  { %v1518_v55 = vsel %vm2323_vm13, %v1517_v63, 1e+30  ;;  %v1563_v63 = vld [vmem:[#allocation2 + $0x68] sm:$0xff] }
 0x875   :  { %1520 = vrot.lane.b32.xlu0 %v1518_v55, %s1777_s12 }
 0x8e7   :  { %v1521_v56 = vpop.permute.xlu0 %1520 }
 0x8e8   :  { %v1522_v54 = vsel %vm1255_vm1, 1e+30, %v1521_v56 }
 0x8e9   :  { %v1523_v57 = vmin.f32 %v1500_v25, %v1522_v54 }
 0x8eb   :  { %v1524_v53 = vmin.f32 %v1523_v57, %v1518_v55 }
 0x8ed   :  { %v1525_v58 = vsub.f32 %v1524_v53, %v1500_v25  ;;  %v1528_v13 = vsub.f32 %v1524_v53, %v1522_v54  ;;  %v1532_v59 = vsub.f32 %v1524_v53, %v1518_v55 }
 0x8ef   :  { %v1526_v50 = vmul.f32 1.442695, %v1525_v58  ;;  %v1529_v61 = vmul.f32 1.442695, %v1528_v13  ;;  %v1533_v1 = vmul.f32 1.442695, %v1532_v59 }
 0x8f1   :  { %1739 = vpow2.f32 %v1526_v50 }
 0x8f2   :  { %1741 = vpow2.f32 %v1529_v61 }
 0x8f3   :  { %1743 = vpow2.f32 %v1533_v1 }
 0x8fb   :  { %v1740_v62 = vpop.eup %1739 }
 0x8fc   :  { %v1742_v31 = vpop.eup %1741 }
 0x8fd   :  { %v1531_v2 = vadd.f32 %v1742_v31, %v1740_v62  ;;  %v1744_v4 = vpop.eup %1743 }
 0x8ff   :  { %v1535_v6 = vadd.f32 %v1744_v4, %v1531_v2 }
 0x901   :  { %1745 = vlog2.f32 %v1535_v6 }
 0x90b   :  { %v1746_v3 = vpop.eup %1745 }
 0x90c   :  { %v1537_v7 = vmul.f32 0.6931472, %v1746_v3 }
 0x90e   :  { %v1538_v9 = vsub.f32 %v1524_v53, %v1537_v7 }
 0x910   :  { %v1539_v10 = vadd.f32 %v1538_v9, %v1519_v29  ;;  %v1585_v29 = vld [vmem:[#allocation2 + $0x70] sm:$0xff] }
 0x912   :  { %v1540_v11 = vsel %vm2323_vm13, %v1539_v10, 1e+30 }
 0x913   :  { %1542 = vrot.lane.b32.xlu1 %v1540_v11, %s1777_s12 }
 0x985   :  { %v1543_v12 = vpop.permute.xlu1 %1542 }
 0x986   :  { %v1544_v22 = vsel %vm1255_vm1, 1e+30, %v1543_v12 }
 0x987   :  { %v1545_v23 = vmin.f32 %v1522_v54, %v1544_v22 }
 0x989   :  { %v1546_v18 = vmin.f32 %v1545_v23, %v1540_v11 }
 0x98b   :  { %v1547_v60 = vsub.f32 %v1546_v18, %v1522_v54  ;;  %v1550_v24 = vsub.f32 %v1546_v18, %v1544_v22  ;;  %v1554_v26 = vsub.f32 %v1546_v18, %v1540_v11 }
 0x98d   :  { %v1548_v16 = vmul.f32 1.442695, %v1547_v60  ;;  %v1551_v33 = vmul.f32 1.442695, %v1550_v24  ;;  %v1555_v19 = vmul.f32 1.442695, %v1554_v26 }
 0x98f   :  { %1747 = vpow2.f32 %v1548_v16 }
 0x990   :  { %1749 = vpow2.f32 %v1551_v33 }
 0x991   :  { %1751 = vpow2.f32 %v1555_v19 }
 0x999   :  { %v1748_v34 = vpop.eup %1747 }
 0x99a   :  { %v1750_v32 = vpop.eup %1749 }
 0x99b   :  { %v1553_v35 = vadd.f32 %v1750_v32, %v1748_v34  ;;  %v1752_v14 = vpop.eup %1751 }
 0x99d   :  { %v1557_v0 = vadd.f32 %v1752_v14, %v1553_v35 }
 0x99f   :  { %1753 = vlog2.f32 %v1557_v0 }
 0x9a9   :  { %v1754_v20 = vpop.eup %1753 }
 0x9aa   :  { %v1559_v28 = vmul.f32 0.6931472, %v1754_v20 }
 0x9ac   :  { %v1560_v37 = vsub.f32 %v1546_v18, %v1559_v28 }
 0x9ae   :  { %v1561_v5 = vadd.f32 %v1560_v37, %v1541_v38 }
 0x9b0   :  { %v1562_v8 = vsel %vm2323_vm13, %v1561_v5, 1e+30 }
 0x9b1   :  { %1564 = vrot.lane.b32.xlu0 %v1562_v8, %s1777_s12 }
 0xa23   :  { %v1565_v25 = vpop.permute.xlu0 %1564 }
 0xa24   :  { %v1566_v47 = vsel %vm1255_vm1, 1e+30, %v1565_v25 }
 0xa25   :  { %v1567_v46 = vmin.f32 %v1544_v22, %v1566_v47 }
 0xa27   :  { %v1568_v15 = vmin.f32 %v1567_v46, %v1562_v8 }
 0xa29   :  { %v1569_v39 = vsub.f32 %v1568_v15, %v1544_v22  ;;  %v1572_v40 = vsub.f32 %v1568_v15, %v1566_v47  ;;  %v1576_v41 = vsub.f32 %v1568_v15, %v1562_v8 }
 0xa2b   :  { %v1570_v42 = vmul.f32 1.442695, %v1569_v39  ;;  %v1573_v43 = vmul.f32 1.442695, %v1572_v40  ;;  %v1577_v44 = vmul.f32 1.442695, %v1576_v41 }
 0xa2d   :  { %1755 = vpow2.f32 %v1570_v42 }
 0xa2e   :  { %1757 = vpow2.f32 %v1573_v43 }
 0xa2f   :  { %1759 = vpow2.f32 %v1577_v44 }
 0xa37   :  { %v1756_v30 = vpop.eup %1755 }
 0xa38   :  { %v1758_v45 = vpop.eup %1757 }
 0xa39   :  { %v1575_v49 = vadd.f32 %v1758_v45, %v1756_v30  ;;  %v1760_v17 = vpop.eup %1759 }
 0xa3b   :  { %v1579_v48 = vadd.f32 %v1760_v17, %v1575_v49 }
 0xa3d   :  { %1761 = vlog2.f32 %v1579_v48 }
 0xa47   :  { %v1762_v27 = vpop.eup %1761 }
 0xa48   :  { %v1581_v52 = vmul.f32 0.6931472, %v1762_v27 }
 0xa4a   :  { %v1582_v36 = vsub.f32 %v1568_v15, %v1581_v52 }
 0xa4c   :  { %v1583_v55 = vadd.f32 %v1582_v36, %v1563_v63 }
 0xa4e   :  { %v1584_v56 = vsel %vm2323_vm13, %v1583_v55, 1e+30 }
 0xa4f   :  { %1586 = vrot.lane.b32.xlu1 %v1584_v56, %s1777_s12 }
 0xac1   :  { %v1587_v54 = vpop.permute.xlu1 %1586 }
 0xac2   :  { %v1588_v57 = vsel %vm1255_vm1, 1e+30, %v1587_v54 }
 0xac3   :  { %v1589_v53 = vmin.f32 %v1566_v47, %v1588_v57 }
 0xac5   :  { %v1590_v58 = vmin.f32 %v1589_v53, %v1584_v56 }
 0xac7   :  { %v1591_v13 = vsub.f32 %v1590_v58, %v1566_v47  ;;  %v1594_v59 = vsub.f32 %v1590_v58, %v1588_v57  ;;  %v1598_v50 = vsub.f32 %v1590_v58, %v1584_v56 }
 0xac9   :  { %v1592_v61 = vmul.f32 1.442695, %v1591_v13  ;;  %v1595_v1 = vmul.f32 1.442695, %v1594_v59  ;;  %v1599_v62 = vmul.f32 1.442695, %v1598_v50 }
 0xacb   :  { %1763 = vpow2.f32 %v1592_v61 }
 0xacc   :  { %1765 = vpow2.f32 %v1595_v1 }
 0xacd   :  { %1767 = vpow2.f32 %v1599_v62 }
 0xad5   :  { %v1764_v31 = vpop.eup %1763 }
 0xad6   :  { %v1766_v2 = vpop.eup %1765 }
 0xad7   :  { %v1597_v4 = vadd.f32 %v1766_v2, %v1764_v31  ;;  %v1768_v6 = vpop.eup %1767 }
 0xad9   :  { %v1601_v3 = vadd.f32 %v1768_v6, %v1597_v4 }
 0xadb   :  { %1769 = vlog2.f32 %v1601_v3 }
 0xae5   :  { %v1770_v7 = vpop.eup %1769 }
 0xae6   :  { %v1603_v21 = vmul.f32 0.6931472, %v1770_v7 }
 0xae8   :  { %v1604_v9 = vsub.f32 %v1590_v58, %v1603_v21 }
 0xaea   :  { %v1605_v10 = vadd.f32 %v1604_v9, %v1585_v29 }
 0xaec   :  { %v1606_v11 = vsel %vm2323_vm13, %v1605_v10, 1e+30 }
 0xaed   :  { %1607 = vst [vmem:[%s2370_s2] sm:$0xff] %v1606_v11 }

</bundles_post_ra>
